<compile_context>
chip_gen: v6e
topology: v6e:2x2x1
jax: 0.10.0
libtpu: 0.0.40
codegen_flags: <defaults>
</compile_context>

<pallas_src>
import jax
import jax.numpy as jnp
import numpy as np
from jax.experimental import pallas as pl
from jax.experimental.pallas import tpu as pltpu


def _round_up(x, m):
    return (x + m - 1) // m * m


# ----------------------------------------------------------------------------
# Kernel: one RotatoryAttention level per grid step (level axis squeezed away)
# ----------------------------------------------------------------------------
def _rot_attn_kernel(z_ref, w_ref, b_ref, wrt_ref, br_ref, out_ref):
    # Per-level shapes (D = feature dim zero-padded to a multiple of 128):
    #   z_ref   (N, S, D)   bf16  slices x tokens x padded features
    #   w_ref   (D, 8*D)    bf16  [WK0|V0|WK1|V1|WK2|V2|WK3|V3]; WKj = W_Aj∘W_Kj
    #   b_ref   (1, 8*D)    f32   folded biases (zero in pad lanes)
    #   wrt_ref (4*D, D)    bf16  W_r^T, zero-padded rows/cols per role slot
    #   br_ref  (1, D)      f32
    #   out_ref (1, D)      f32   lane-dense 128-wide output slab
    N, S, D = z_ref.shape
    T = N - 2                                 # number of (left, target, right) triples

    z = z_ref[...]                            # (N, S, D) bf16

    # One wide bf16 MXU matmul projects every token for every role's folded
    # key-projection and value head; accumulate in f32.
    proj = (jnp.dot(z.reshape(N * S, D), w_ref[...],
                    preferred_element_type=jnp.float32) + b_ref[...])
    proj = proj.reshape(N, S, 8 * D)          # free reshape when S % 8 == 0

    # Queries of the first attention pair: per-triple token-mean of the target.
    r_t = jnp.mean(z[1:N - 1].astype(jnp.float32), axis=1, keepdims=True)   # (T,1,D)

    def attn(rows, k_slot, v_slot, q):
        # rows: (T, S, 8D) f32 projection rows for this role; q: (T, 1, D) f32.
        wk = rows[..., k_slot * D:(k_slot + 1) * D]   # lane-aligned views (slots 128-wide)
        v = rows[..., v_slot * D:(v_slot + 1) * D]
        # Batched-over-triples MXU contraction for the logits (no XLU lane reduce).
        e = jnp.tanh(jnp.einsum('tqd,tsd->tqs', q, wk,
                                preferred_element_type=jnp.float32))        # (T,1,S)
        # tanh bounds logits to [-1, 1] -> exp is safe without a max shift.
        p = jnp.exp(e)
        a = p * pl.reciprocal(jnp.sum(p, axis=-1, keepdims=True), approx=True)
        return jnp.einsum('tqs,tsd->tqd', a, v,
                          preferred_element_type=jnp.float32)               # (T,1,D)

    p_left, p_target, p_right = proj[0:T], proj[1:N - 1], proj[2:N]
    r_l = attn(p_left, 0, 1, r_t)       # single_attention_target_left
    r_r = attn(p_right, 2, 3, r_t)      # single_attention_target_right
    r_lt = attn(p_target, 4, 5, r_l)    # single_attention_left_target
    r_rt = attn(p_target, 6, 7, r_r)    # single_attention_right_target

    # Mean over triples, one lane-concat of the 4 role results, and a single
    # fused (1,4D)@(4D,D) W_r matmul (instead of 4 separate M=1 MXU round trips).
    cat = jnp.concatenate([jnp.sum(r_l, axis=0), jnp.sum(r_r, axis=0),
                           jnp.sum(r_lt, axis=0), jnp.sum(r_rt, axis=0)],
                          axis=-1) * (1.0 / T)                              # (1, 4D)
    out_ref[...] = (jnp.dot(cat.astype(wrt_ref.dtype), wrt_ref[...],
                            preferred_element_type=jnp.float32) + br_ref[...])


# ----------------------------------------------------------------------------
# Host-side weight folding + lane-aligned packing (run ONCE per param change)
# ----------------------------------------------------------------------------
def _fold_level(p, D):
    """Fold W_A ∘ W_K into one df->df linear and pack the 4 roles'
    [folded-K | V] weights into lane-aligned, zero-padded 128-wide slots."""
    df = p["wrt"].shape[1]

    # W_A(W_K(x)) = x @ (W_K^T @ W_A^T) + (b_K @ W_A^T + b_A)
    wc = jnp.einsum("jik,jkl->jil", p["wkt"], p["wat"])             # (4, df, df)
    bc = jnp.einsum("jk,jkl->jl", p["bk"], p["wat"]) + p["ba"]      # (4, df)

    def pad_w(w):   # (r, c) -> (D, D), zero padded
        return jnp.pad(w, ((0, D - w.shape[0]), (0, D - w.shape[1])))

    def pad_b(b):   # (c,) -> (D,)
        return jnp.pad(b, (0, D - b.shape[0]))

    w_all = jnp.concatenate(
        [x for j in range(4) for x in (pad_w(wc[j]), pad_w(p["wvt"][j]))], axis=-1)
    b_all = jnp.concatenate(
        [x for j in range(4) for x in (pad_b(bc[j]), pad_b(p["bv"][j]))],
        axis=-1).reshape(1, 8 * D)
    wrt_pad = jnp.concatenate(
        [pad_w(p["wrt"][k * df:(k + 1) * df, :]) for k in range(4)], axis=0)  # (4D, D)
    br_pad = jnp.pad(p["br"], ((0, 0), (0, D - df)))
    return (w_all.astype(jnp.bfloat16), b_all.astype(jnp.float32),
            wrt_pad.astype(jnp.bfloat16), br_pad.astype(jnp.float32))


def fold_params(params):
    """Fold / pad / stack the per-level weights.  Hoisted out of the
    per-forward path (perf rec): call once, pass results to the forward."""
    dfs = [int(p["wrt"].shape[1]) for p in params]
    D = max(_round_up(df, 128) for df in dfs)
    folded = [_fold_level(p, D) for p in params]
    w_all = jnp.stack([f[0] for f in folded])       # (L, D, 8D)  bf16
    b_all = jnp.stack([f[1] for f in folded])       # (L, 1, 8D)  f32
    wrt = jnp.stack([f[2] for f in folded])         # (L, 4D, D)  bf16
    br = jnp.stack([f[3] for f in folded])          # (L, 1, D)   f32
    return w_all, b_all, wrt, br


# ----------------------------------------------------------------------------
# Jitted forward: one pallas_call, grid=(levels,), "parallel" over levels
# ----------------------------------------------------------------------------
@jax.jit
def rotatory_attention(z1, z2, z3, w_all, b_all, wrt, br):
    # TODO(synk): levels with differing (N, S) would need separate calls or
    # ragged handling; the stacked grid=(L,) layout assumes they match.
    assert z1.shape[:2] == z2.shape[:2] == z3.shape[:2]
    L, D = w_all.shape[0], w_all.shape[1]
    N, S = z1.shape[0], z1.shape[1]

    # Layout plumbing only: zero-pad the feature dim to the common lane-aligned
    # width D, cast to bf16 for the MXU, stack levels for one kernel launch.
    Z = jnp.stack([
        jnp.pad(z, ((0, 0), (0, 0), (0, D - z.shape[-1]))).astype(jnp.bfloat16)
        for z in (z1, z2, z3)])                                      # (L, N, S, D)

    outs = pl.pallas_call(
        _rot_attn_kernel,
        out_shape=jax.ShapeDtypeStruct((L, 1, D), jnp.float32),
        grid=(L,),
        in_specs=[
            pl.BlockSpec((None, N, S, D), lambda l: (l, 0, 0, 0)),
            pl.BlockSpec((None, D, 8 * D), lambda l: (l, 0, 0)),
            pl.BlockSpec((None, 1, 8 * D), lambda l: (l, 0, 0)),
            pl.BlockSpec((None, 4 * D, D), lambda l: (l, 0, 0)),
            pl.BlockSpec((None, 1, D), lambda l: (l, 0, 0)),
        ],
        out_specs=pl.BlockSpec((None, 1, D), lambda l: (l, 0, 0)),
        # Levels are independent: on v7x the two TensorCores split the grid;
        # on v5e/v6e this is a short loop with DMA/compute overlap.
        compiler_params=pltpu.CompilerParams(
            dimension_semantics=("parallel",)),
        # Scaling guard (review): all blocks total well under 1 MiB here.  If
        # N*S*D or 8*D*D ever approaches the 32 MiB scoped-VMEM default
        # (64 MiB physical on v7x), tile the N axis and/or raise
        # vmem_limit_bytes in CompilerParams.
    )(Z, w_all, b_all, wrt, br)

    return tuple(outs[l, :, :z.shape[-1]].reshape(1, 1, z.shape[-1])
                 for l, z in enumerate((z1, z2, z3)))


# ----------------------------------------------------------------------------
# Deterministic parameter init (weights stored pre-transposed: y = x @ W^T + b)
# ----------------------------------------------------------------------------
def init_level_params(key, df, dk, dv):
    assert dv == df, "module math requires dv == df (r_l is reused as a query)"
    ks = jax.random.split(key, 8)
    s = 0.1
    return dict(
        wkt=s * jax.random.normal(ks[0], (4, df, dk), jnp.float32),   # W_K^T
        bk=s * jax.random.normal(ks[1], (4, dk), jnp.float32),
        wvt=s * jax.random.normal(ks[2], (4, df, dv), jnp.float32),   # W_V^T
        bv=s * jax.random.normal(ks[3], (4, dv), jnp.float32),
        wat=s * jax.random.normal(ks[4], (4, dk, df), jnp.float32),   # ActivatedGeneral W^T
        ba=s * jax.random.normal(ks[5], (4, df), jnp.float32),
        wrt=s * jax.random.normal(ks[6], (4 * df, df), jnp.float32),  # W_r^T
        br=s * jax.random.normal(ks[7], (1, df), jnp.float32),
    )


# ----------------------------------------------------------------------------
# Pure-JAX reference (mirrors the PyTorch forward exactly, in f32)
# ----------------------------------------------------------------------------
def ref_level(z, p):
    N = z.shape[0]

    def single(r, x, j):
        K = x @ p["wkt"][j] + p["bk"][j]
        V = x @ p["wvt"][j] + p["bv"][j]
        e = jnp.tanh((K @ p["wat"][j] + p["ba"][j]) @ r)
        a = jax.nn.softmax(e, axis=0)
        return V.T @ a

    rs = []
    for i in range(1, N - 1):
        left, target, right = z[i - 1], z[i], z[i + 1]
        r_t = jnp.mean(target, axis=0)
        r_l = single(r_t, left, 0)
        r_r = single(r_t, right, 1)
        r_l_t = single(r_l, target, 2)
        r_r_t = single(r_r, target, 3)
        rs.append(jnp.concatenate([r_l, r_r, r_l_t, r_r_t]))
    r = jnp.mean(jnp.stack(rs, axis=0), axis=0)
    return (r @ p["wrt"] + p["br"][0]).reshape(1, 1, -1)


if __name__ == "__main__":
    key = jax.random.PRNGKey(0)

    # Small synthetic config: df per level, dk per level, dv == df.
    N, S = 5, 16
    df = [32, 64, 16]
    dk = [16, 32, 8]

    k_in, k_par = jax.random.split(key)
    kz = jax.random.split(k_in, 3)
    z1 = jax.random.normal(kz[0], (N, S, df[0]), jnp.float32)
    z2 = jax.random.normal(kz[1], (N, S, df[1]), jnp.float32)
    z3 = jax.random.normal(kz[2], (N, S, df[2]), jnp.float32)

    kp = jax.random.split(k_par, 3)
    params = [init_level_params(kp[l], df[l], dk[l], df[l]) for l in range(3)]

    # Fold/pack weights ONCE (outside the per-forward path), then run the kernel.
    w_all, b_all, wrt, br = fold_params(params)
    r1, r2, r3 = rotatory_attention(z1, z2, z3, w_all, b_all, wrt, br)
    jax.block_until_ready((r1, r2, r3))

    # Validate against the f32 pure-JAX reference of the PyTorch forward.
    # Tolerance is looser than fp32-exact because the kernel uses bf16 MXU
    # inputs (z / folded weights / W_r), the host-folded W_A∘W_K weights, and
    # the EUP approximate reciprocal in the softmax denominator.
    for out, z, p in [(r1, z1, params[0]), (r2, z2, params[1]), (r3, z3, params[2])]:
        ref = ref_level(z, p)
        np.testing.assert_allclose(np.asarray(out), np.asarray(ref),
                                   rtol=2e-2, atol=2e-2)

    print("KERNEL_OK")
</pallas_src>

<mosaic_0001>
module attributes {stable_mosaic.version = 11 : i64} {
  func.func @_rot_attn_kernel(%arg0: i32, %arg1: memref<1x5x16x128xbf16, #tpu.memory_space<vmem>>, %arg2: memref<1x128x1024xbf16, #tpu.memory_space<vmem>>, %arg3: memref<1x1x1024xf32, #tpu.memory_space<vmem>>, %arg4: memref<1x512x128xbf16, #tpu.memory_space<vmem>>, %arg5: memref<1x1x128xf32, #tpu.memory_space<vmem>>, %arg6: memref<1x1x128xf32, #tpu.memory_space<vmem>>) attributes {dimension_semantics = [#tpu.dimension_semantics<parallel>], iteration_bounds = array<i64: 3>, scalar_prefetch = 0 : i64, scratch_operands = 0 : i64, tpu.core_type = #tpu.core_type<tc>, window_params = [{transform_indices = @transform_0, window_bounds = array<i64: 1, 5, 16, 128>}, {transform_indices = @transform_1, window_bounds = array<i64: 1, 128, 1024>}, {transform_indices = @transform_2, window_bounds = array<i64: 1, 1, 1024>}, {transform_indices = @transform_3, window_bounds = array<i64: 1, 512, 128>}, {transform_indices = @transform_4, window_bounds = array<i64: 1, 1, 128>}, {transform_indices = @transform_5, window_bounds = array<i64: 1, 1, 128>}]} {
    %c0 = arith.constant 0 : index
    %c0_0 = arith.constant 0 : index
    %c0_1 = arith.constant 0 : index
    %c0_2 = arith.constant 0 : index
    %0 = vector.load %arg1[%c0, %c0_0, %c0_1, %c0_2] : memref<1x5x16x128xbf16, #tpu.memory_space<vmem>>, vector<1x5x16x128xbf16>
    %1 = vector.shape_cast %0 : vector<1x5x16x128xbf16> to vector<5x16x128xbf16>
    %2 = vector.shape_cast %1 : vector<5x16x128xbf16> to vector<80x128xbf16>
    %c0_3 = arith.constant 0 : index
    %c0_4 = arith.constant 0 : index
    %c0_5 = arith.constant 0 : index
    %3 = vector.load %arg2[%c0_3, %c0_4, %c0_5] : memref<1x128x1024xbf16, #tpu.memory_space<vmem>>, vector<1x128x1024xbf16>
    %4 = vector.shape_cast %3 : vector<1x128x1024xbf16> to vector<128x1024xbf16>
    %cst = arith.constant dense<0.000000e+00> : vector<80x1024xf32>
    %5 = tpu.matmul %2, %4, %cst {dimension_numbers = #tpu.dot_dimension_numbers<[1], [0], [0], [1], [0, 0, 1, 1], [], []>} : vector<80x128xbf16>, vector<128x1024xbf16>, vector<80x1024xf32> -> vector<80x1024xf32>
    %c0_6 = arith.constant 0 : index
    %c0_7 = arith.constant 0 : index
    %c0_8 = arith.constant 0 : index
    %6 = vector.load %arg3[%c0_6, %c0_7, %c0_8] : memref<1x1x1024xf32, #tpu.memory_space<vmem>>, vector<1x1x1024xf32>
    %7 = vector.shape_cast %6 : vector<1x1x1024xf32> to vector<1x1024xf32>
    %8 = vector.broadcast %7 : vector<1x1024xf32> to vector<80x1024xf32>
    %9 = arith.addf %5, %8 : vector<80x1024xf32>
    %10 = vector.shape_cast %9 : vector<80x1024xf32> to vector<5x16x1024xf32>
    %11 = vector.extract_strided_slice %1 {offsets = [1, 0, 0], sizes = [3, 16, 128], strides = [1, 1, 1]} : vector<5x16x128xbf16> to vector<3x16x128xbf16>
    %12 = arith.extf %11 : vector<3x16x128xbf16> to vector<3x16x128xf32>
    %cst_9 = arith.constant dense<0.000000e+00> : vector<3x128xf32>
    %13 = vector.multi_reduction <add>, %12, %cst_9 [1] : vector<3x16x128xf32> to vector<3x128xf32>
    %14 = vector.shape_cast %13 : vector<3x128xf32> to vector<3x1x128xf32>
    %cst_10 = arith.constant 1.600000e+01 : f32
    %15 = vector.broadcast %cst_10 : f32 to vector<3x1x128xf32>
    %16 = arith.divf %14, %15 : vector<3x1x128xf32>
    %17 = vector.extract_strided_slice %10 {offsets = [0, 0, 0], sizes = [3, 16, 1024], strides = [1, 1, 1]} : vector<5x16x1024xf32> to vector<3x16x1024xf32>
    %18 = vector.extract_strided_slice %10 {offsets = [1, 0, 0], sizes = [3, 16, 1024], strides = [1, 1, 1]} : vector<5x16x1024xf32> to vector<3x16x1024xf32>
    %19 = vector.extract_strided_slice %10 {offsets = [2, 0, 0], sizes = [3, 16, 1024], strides = [1, 1, 1]} : vector<5x16x1024xf32> to vector<3x16x1024xf32>
    %20 = vector.extract_strided_slice %17 {offsets = [0, 0, 0], sizes = [3, 16, 128], strides = [1, 1, 1]} : vector<3x16x1024xf32> to vector<3x16x128xf32>
    %21 = vector.extract_strided_slice %17 {offsets = [0, 0, 128], sizes = [3, 16, 128], strides = [1, 1, 1]} : vector<3x16x1024xf32> to vector<3x16x128xf32>
    "tpu.trace_start"() <{level = 10 : i32, message = "tqd,tsd->tqs"}> : () -> ()
    %cst_11 = arith.constant dense<0.000000e+00> : vector<3x1x16xf32>
    %22 = tpu.matmul %16, %20, %cst_11 {dimension_numbers = #tpu.dot_dimension_numbers<[2], [2], [1], [1], [0, 0, 0, 1, 1, 1], [0], [0]>} : vector<3x1x128xf32>, vector<3x16x128xf32>, vector<3x1x16xf32> -> vector<3x1x16xf32>
    "tpu.trace_stop"() : () -> ()
    %23 = math.tanh %22 : vector<3x1x16xf32>
    %24 = math.exp %23 : vector<3x1x16xf32>
    %cst_12 = arith.constant dense<0.000000e+00> : vector<3x1xf32>
    %25 = vector.multi_reduction <add>, %24, %cst_12 [2] : vector<3x1x16xf32> to vector<3x1xf32>
    %26 = vector.shape_cast %25 : vector<3x1xf32> to vector<3x1x1xf32>
    %27 = tpu.reciprocal %26 {approx = true} : vector<3x1x1xf32> -> vector<3x1x1xf32>
    %28 = vector.broadcast %27 : vector<3x1x1xf32> to vector<3x1x16xf32>
    %29 = arith.mulf %24, %28 : vector<3x1x16xf32>
    "tpu.trace_start"() <{level = 10 : i32, message = "tqs,tsd->tqd"}> : () -> ()
    %cst_13 = arith.constant dense<0.000000e+00> : vector<3x1x128xf32>
    %30 = tpu.matmul %29, %21, %cst_13 {dimension_numbers = #tpu.dot_dimension_numbers<[2], [1], [1], [2], [0, 0, 0, 1, 1, 2], [0], [0]>} : vector<3x1x16xf32>, vector<3x16x128xf32>, vector<3x1x128xf32> -> vector<3x1x128xf32>
    "tpu.trace_stop"() : () -> ()
    %31 = vector.extract_strided_slice %19 {offsets = [0, 0, 256], sizes = [3, 16, 128], strides = [1, 1, 1]} : vector<3x16x1024xf32> to vector<3x16x128xf32>
    %32 = vector.extract_strided_slice %19 {offsets = [0, 0, 384], sizes = [3, 16, 128], strides = [1, 1, 1]} : vector<3x16x1024xf32> to vector<3x16x128xf32>
    "tpu.trace_start"() <{level = 10 : i32, message = "tqd,tsd->tqs"}> : () -> ()
    %cst_14 = arith.constant dense<0.000000e+00> : vector<3x1x16xf32>
    %33 = tpu.matmul %16, %31, %cst_14 {dimension_numbers = #tpu.dot_dimension_numbers<[2], [2], [1], [1], [0, 0, 0, 1, 1, 1], [0], [0]>} : vector<3x1x128xf32>, vector<3x16x128xf32>, vector<3x1x16xf32> -> vector<3x1x16xf32>
    "tpu.trace_stop"() : () -> ()
    %34 = math.tanh %33 : vector<3x1x16xf32>
    %35 = math.exp %34 : vector<3x1x16xf32>
    %cst_15 = arith.constant dense<0.000000e+00> : vector<3x1xf32>
    %36 = vector.multi_reduction <add>, %35, %cst_15 [2] : vector<3x1x16xf32> to vector<3x1xf32>
    %37 = vector.shape_cast %36 : vector<3x1xf32> to vector<3x1x1xf32>
    %38 = tpu.reciprocal %37 {approx = true} : vector<3x1x1xf32> -> vector<3x1x1xf32>
    %39 = vector.broadcast %38 : vector<3x1x1xf32> to vector<3x1x16xf32>
    %40 = arith.mulf %35, %39 : vector<3x1x16xf32>
    "tpu.trace_start"() <{level = 10 : i32, message = "tqs,tsd->tqd"}> : () -> ()
    %cst_16 = arith.constant dense<0.000000e+00> : vector<3x1x128xf32>
    %41 = tpu.matmul %40, %32, %cst_16 {dimension_numbers = #tpu.dot_dimension_numbers<[2], [1], [1], [2], [0, 0, 0, 1, 1, 2], [0], [0]>} : vector<3x1x16xf32>, vector<3x16x128xf32>, vector<3x1x128xf32> -> vector<3x1x128xf32>
    "tpu.trace_stop"() : () -> ()
    %42 = vector.extract_strided_slice %18 {offsets = [0, 0, 512], sizes = [3, 16, 128], strides = [1, 1, 1]} : vector<3x16x1024xf32> to vector<3x16x128xf32>
    %43 = vector.extract_strided_slice %18 {offsets = [0, 0, 640], sizes = [3, 16, 128], strides = [1, 1, 1]} : vector<3x16x1024xf32> to vector<3x16x128xf32>
    "tpu.trace_start"() <{level = 10 : i32, message = "tqd,tsd->tqs"}> : () -> ()
    %cst_17 = arith.constant dense<0.000000e+00> : vector<3x1x16xf32>
    %44 = tpu.matmul %30, %42, %cst_17 {dimension_numbers = #tpu.dot_dimension_numbers<[2], [2], [1], [1], [0, 0, 0, 1, 1, 1], [0], [0]>} : vector<3x1x128xf32>, vector<3x16x128xf32>, vector<3x1x16xf32> -> vector<3x1x16xf32>
    "tpu.trace_stop"() : () -> ()
    %45 = math.tanh %44 : vector<3x1x16xf32>
    %46 = math.exp %45 : vector<3x1x16xf32>
    %cst_18 = arith.constant dense<0.000000e+00> : vector<3x1xf32>
    %47 = vector.multi_reduction <add>, %46, %cst_18 [2] : vector<3x1x16xf32> to vector<3x1xf32>
    %48 = vector.shape_cast %47 : vector<3x1xf32> to vector<3x1x1xf32>
    %49 = tpu.reciprocal %48 {approx = true} : vector<3x1x1xf32> -> vector<3x1x1xf32>
    %50 = vector.broadcast %49 : vector<3x1x1xf32> to vector<3x1x16xf32>
    %51 = arith.mulf %46, %50 : vector<3x1x16xf32>
    "tpu.trace_start"() <{level = 10 : i32, message = "tqs,tsd->tqd"}> : () -> ()
    %cst_19 = arith.constant dense<0.000000e+00> : vector<3x1x128xf32>
    %52 = tpu.matmul %51, %43, %cst_19 {dimension_numbers = #tpu.dot_dimension_numbers<[2], [1], [1], [2], [0, 0, 0, 1, 1, 2], [0], [0]>} : vector<3x1x16xf32>, vector<3x16x128xf32>, vector<3x1x128xf32> -> vector<3x1x128xf32>
    "tpu.trace_stop"() : () -> ()
    %53 = vector.extract_strided_slice %18 {offsets = [0, 0, 768], sizes = [3, 16, 128], strides = [1, 1, 1]} : vector<3x16x1024xf32> to vector<3x16x128xf32>
    %54 = vector.extract_strided_slice %18 {offsets = [0, 0, 896], sizes = [3, 16, 128], strides = [1, 1, 1]} : vector<3x16x1024xf32> to vector<3x16x128xf32>
    "tpu.trace_start"() <{level = 10 : i32, message = "tqd,tsd->tqs"}> : () -> ()
    %cst_20 = arith.constant dense<0.000000e+00> : vector<3x1x16xf32>
    %55 = tpu.matmul %41, %53, %cst_20 {dimension_numbers = #tpu.dot_dimension_numbers<[2], [2], [1], [1], [0, 0, 0, 1, 1, 1], [0], [0]>} : vector<3x1x128xf32>, vector<3x16x128xf32>, vector<3x1x16xf32> -> vector<3x1x16xf32>
    "tpu.trace_stop"() : () -> ()
    %56 = math.tanh %55 : vector<3x1x16xf32>
    %57 = math.exp %56 : vector<3x1x16xf32>
    %cst_21 = arith.constant dense<0.000000e+00> : vector<3x1xf32>
    %58 = vector.multi_reduction <add>, %57, %cst_21 [2] : vector<3x1x16xf32> to vector<3x1xf32>
    %59 = vector.shape_cast %58 : vector<3x1xf32> to vector<3x1x1xf32>
    %60 = tpu.reciprocal %59 {approx = true} : vector<3x1x1xf32> -> vector<3x1x1xf32>
    %61 = vector.broadcast %60 : vector<3x1x1xf32> to vector<3x1x16xf32>
    %62 = arith.mulf %57, %61 : vector<3x1x16xf32>
    "tpu.trace_start"() <{level = 10 : i32, message = "tqs,tsd->tqd"}> : () -> ()
    %cst_22 = arith.constant dense<0.000000e+00> : vector<3x1x128xf32>
    %63 = tpu.matmul %62, %54, %cst_22 {dimension_numbers = #tpu.dot_dimension_numbers<[2], [1], [1], [2], [0, 0, 0, 1, 1, 2], [0], [0]>} : vector<3x1x16xf32>, vector<3x16x128xf32>, vector<3x1x128xf32> -> vector<3x1x128xf32>
    "tpu.trace_stop"() : () -> ()
    %cst_23 = arith.constant dense<0.000000e+00> : vector<1x128xf32>
    %64 = vector.multi_reduction <add>, %30, %cst_23 [0] : vector<3x1x128xf32> to vector<1x128xf32>
    %cst_24 = arith.constant dense<0.000000e+00> : vector<1x128xf32>
    %65 = vector.multi_reduction <add>, %41, %cst_24 [0] : vector<3x1x128xf32> to vector<1x128xf32>
    %cst_25 = arith.constant dense<0.000000e+00> : vector<1x128xf32>
    %66 = vector.multi_reduction <add>, %52, %cst_25 [0] : vector<3x1x128xf32> to vector<1x128xf32>
    %cst_26 = arith.constant dense<0.000000e+00> : vector<1x128xf32>
    %67 = vector.multi_reduction <add>, %63, %cst_26 [0] : vector<3x1x128xf32> to vector<1x128xf32>
    %68 = tpu.concatenate %64, %65, %66, %67 in 1 : vector<1x128xf32>, vector<1x128xf32>, vector<1x128xf32>, vector<1x128xf32> -> vector<1x512xf32>
    %cst_27 = arith.constant 0.333333343 : f32
    %69 = vector.broadcast %cst_27 : f32 to vector<1x512xf32>
    %70 = arith.mulf %68, %69 : vector<1x512xf32>
    %71 = arith.truncf %70 : vector<1x512xf32> to vector<1x512xbf16>
    %c0_28 = arith.constant 0 : index
    %c0_29 = arith.constant 0 : index
    %c0_30 = arith.constant 0 : index
    %72 = vector.load %arg4[%c0_28, %c0_29, %c0_30] : memref<1x512x128xbf16, #tpu.memory_space<vmem>>, vector<1x512x128xbf16>
    %73 = vector.shape_cast %72 : vector<1x512x128xbf16> to vector<512x128xbf16>
    %cst_31 = arith.constant dense<0.000000e+00> : vector<1x128xf32>
    %74 = tpu.matmul %71, %73, %cst_31 {dimension_numbers = #tpu.dot_dimension_numbers<[1], [0], [0], [1], [0, 0, 1, 1], [], []>} : vector<1x512xbf16>, vector<512x128xbf16>, vector<1x128xf32> -> vector<1x128xf32>
    %c0_32 = arith.constant 0 : index
    %c0_33 = arith.constant 0 : index
    %c0_34 = arith.constant 0 : index
    %75 = vector.load %arg5[%c0_32, %c0_33, %c0_34] : memref<1x1x128xf32, #tpu.memory_space<vmem>>, vector<1x1x128xf32>
    %76 = vector.shape_cast %75 : vector<1x1x128xf32> to vector<1x128xf32>
    %77 = arith.addf %74, %76 : vector<1x128xf32>
    %c0_35 = arith.constant 0 : index
    %c0_36 = arith.constant 0 : index
    %c0_37 = arith.constant 0 : index
    %78 = vector.load %arg6[%c0_35, %c0_36, %c0_37] : memref<1x1x128xf32, #tpu.memory_space<vmem>>, vector<1x1x128xf32>
    %79 = vector.shape_cast %78 : vector<1x1x128xf32> to vector<1x128xf32>
    %80 = vector.shape_cast %77 : vector<1x128xf32> to vector<1x1x128xf32>
    tpu.vector_store %arg6[%c0_35, %c0_36, %c0_37], %80 {strides = array<i32>} : memref<1x1x128xf32, #tpu.memory_space<vmem>>, vector<1x1x128xf32>,
    return
  }
  func.func @transform_0(%arg0: i32) -> (i32, i32, i32, i32) {
    %c0_i32 = arith.constant 0 : i32
    %c0_i32_0 = arith.constant 0 : i32
    %c0_i32_1 = arith.constant 0 : i32
    %c0_i32_2 = arith.constant 0 : i32
    return %arg0, %c0_i32, %c0_i32_0, %c0_i32_1 : i32, i32, i32, i32
  }
  func.func @transform_1(%arg0: i32) -> (i32, i32, i32) {
    %c0_i32 = arith.constant 0 : i32
    %c0_i32_0 = arith.constant 0 : i32
    %c0_i32_1 = arith.constant 0 : i32
    return %arg0, %c0_i32, %c0_i32_0 : i32, i32, i32
  }
  func.func @transform_2(%arg0: i32) -> (i32, i32, i32) {
    %c0_i32 = arith.constant 0 : i32
    %c0_i32_0 = arith.constant 0 : i32
    %c0_i32_1 = arith.constant 0 : i32
    return %arg0, %c0_i32, %c0_i32_0 : i32, i32, i32
  }
  func.func @transform_3(%arg0: i32) -> (i32, i32, i32) {
    %c0_i32 = arith.constant 0 : i32
    %c0_i32_0 = arith.constant 0 : i32
    %c0_i32_1 = arith.constant 0 : i32
    return %arg0, %c0_i32, %c0_i32_0 : i32, i32, i32
  }
  func.func @transform_4(%arg0: i32) -> (i32, i32, i32) {
    %c0_i32 = arith.constant 0 : i32
    %c0_i32_0 = arith.constant 0 : i32
    %c0_i32_1 = arith.constant 0 : i32
    return %arg0, %c0_i32, %c0_i32_0 : i32, i32, i32
  }
  func.func @transform_5(%arg0: i32) -> (i32, i32, i32) {
    %c0_i32 = arith.constant 0 : i32
    %c0_i32_0 = arith.constant 0 : i32
    %c0_i32_1 = arith.constant 0 : i32
    return %arg0, %c0_i32, %c0_i32_0 : i32, i32, i32
  }
}

</mosaic_0001>

<bundles_post_ra>
// kernel: rotatory_attention.1
= control target key start
LH: loop header
LB: loop body
LE: loop exit
PB: predicated region body
PF: predicated region fallthrough
CT: control target
= control target key end

     0   :  { %10 = vsyncpa [#allocation3], 0  ;;  %s4671_s0 = inlined_call_operand.vmem [shape: bf16[3,5,16,128], index: 0, kind: input, shape index: {}]   ;;  %s4672_s1 = inlined_call_operand.hbm [shape: bf16[3,128,1024], index: 1, kind: input, shape index: {}]   ;;  %s4673_s2 = inlined_call_operand.vmem [shape: f32[3,1,1024], index: 2, kind: input, shape index: {}]   ;;  %s4674_s3 = inlined_call_operand.vmem [shape: bf16[3,512,128], index: 3, kind: input, shape index: {}]   ;;  %s4675_s4 = inlined_call_operand.vmem [shape: f32[3,1,128], index: 4, kind: input, shape index: {}]   ;;  %s4676_s5 = inlined_call_operand.vmem [shape: f32[3,1,128], index: 5, kind: output, shape index: {}]  }
   0x1   :  { %12 = vsyncpa [#allocation3 + $0x1], 0  ;;  %s4065_s18 = smov 0   ;;  %s4067_s19 = smov 0  }
   0x2   :  { %s4069_s20 = smov 0   ;;  %s4071_s21 = smov 0  }
   0x3 LB: > { %s4084_s22 = sadd.s32 4294967295, %s4027_s21   ;;  %s4087_s23 = sadd.s32 1, %s4027_s21   ;;  %s4027_s21 = sphi %s4071_s21, %s4685_s21   ;;  %s4023_s20 = sphi %s4069_s20, %s4684_s20   ;;  %s4019_s19 = sphi %s4067_s19, %s4683_s19   ;;  %s4015_s18 = sphi %s4065_s18, %s4682_s18  }
   0x4   : > { %s48_s24 = ssub.s32 %s4027_s21, %s4087_s23  ;;  %s51_s25 = sadd.s32 1, %s4023_s20 }
   0x5   : > { %p49_p0 = scmp.eq.s32.totalorder %s48_s24, 0  ;;  %p58_p1 = scmp.ne.s32.totalorder %s4023_s20, %s4019_s19 }
   0x6   : > { %p59_p2 = scmp.eq.s32.totalorder %s4027_s21, 0  ;;  %p64_p3 = scmp.ne.s32.totalorder %s4019_s19, %s4015_s18 }
   0x7   : > { %s4097_s26 = scalar_select %p49_p0, %s4023_s20, %s51_s25  }
   0x8   : > { %p60_p4 = por %p59_p2, %p58_p1  ;;  %p65_p5 = scmp.eq.s32.totalorder %s4084_s22, 0 }
   0x9   : > { %p3815_p6 = scmp.lt.s32.totalorder %s4027_s21, 3  ;;  %s200_s28 = sand.u32 1, %s4023_s20  }
   0xa   : > { %p4101_p7 = por %p65_p5, %p64_p3  ;;  %s3398_s29 = sshll.u32 %s200_s28, 9 }
   0xb   : > { %s3522_s30 = sshll.u32 %s4027_s21, 13  ;;  %s204_s9 = scalar_lea.vmem [#allocation2], %s3398_s29 }
   0xc   : > { %s4678_s27 = scalar_select %p4101_p7, 1, 0 }
   0xd   : > { %s4110_s8 = scalar_lea.hbm %s4672_s1, %s3522_s30  ;;  %s211_s10 = sshll.u32 %s204_s9, 4  ;;  %s4112_s10 = int_to_ptr.vmem [resolvable:$true] %s211_s10 }
   0xe   : > { %p4114_p8 = pnand %p3815_p6, %p60_p4  ;;  %s4119_s12 = scalar_lea.sflag [#allocation3], %s200_s28 }
   0xf   : > { %s3965_s13 = scalar_lea.hbm %s4110_s8, 8192  ;;  %s3970_s16 = scalar_lea.hbm %s4672_s1, 24576 }
  0x10   : > { %p3966_p10 = scmp.ne.s32.totalorder %s4110_s8, %s3965_s13  ;;  %p3967_p11 = pneg %p4114_p8 }
  0x11   : > { %p3971_p0 = scmp.lt.s32.totalorder %s4110_s8, %s4672_s1  ;;  %p3972_p1 = scmp.lt.s32.totalorder %s3970_s16, %s3965_s13 }
  0x12   : > { %p3968_p12 = pnand %p3967_p11, %p3966_p10 }
  0x13   : > { %p3973_p2 = por %p3972_p1, %p3971_p0 }
  0x14   : > { %p3969_p13 = pneg %p3968_p12 }
  0x16   : > { %p3974_p3 = pnand %p3973_p2, %p3969_p13 }
  0x18   : > { %3977 = shalt.err (!%p3974_p3)
}
  0x19   : > { %s3978_s24 = scalar_lea.vmem %s4112_s10, 8192  ;;  %s4029_s25 = smov [#allocation2]  }
  0x1a   : > { %p3979_p4 = scmp.ne.s32.totalorder %s4112_s10, %s3978_s24  ;;  %s3983_s28 = sshll.u32 %s4029_s25, 4  ;;  %s3984_s28 = int_to_ptr.vmem [resolvable:$false] %s3983_s28 }
  0x1b   : > { %s3985_s29 = scalar_lea.vmem %s3984_s28, 16384  ;;  %p3986_p10 = scmp.lt.s32.totalorder %s4112_s10, %s3984_s28 }
  0x1c   : > { %p3981_p5 = pnand %p3979_p4, %p3967_p11  ;;  %p3987_p12 = scmp.lt.s32.totalorder %s3985_s29, %s3978_s24 }
  0x1e   : > { %p3982_p6 = pneg %p3981_p5  ;;  %p3988_p9 = por %p3987_p12, %p3986_p10 }
  0x20   : > { %p3989_p7 = pnand %p3988_p9, %p3982_p6 }
  0x22   : > { %3992 = shalt.err (!%p3989_p7)
}
  0x23   : > { %s4030_s30 = smov 512   ;;  %s4031_s6 = smov 32  }
  0x24   : > { %3814 = dma.hbm_to_vmem [thread:$0]  (!%p4114_p8), %s4110_s8, 8192, %s4112_s10, %s4119_s12, %s4030_s30, %s4030_s30, %s4031_s6  }
  0x25   : > { %p240_p11 = scmp.lt.s32.totalorder %s4027_s21, 4  ;;  %p4680_p13 = scmp.ge.s32.totalorder %s4027_s21, 1 }
  0x27   : > { %p241_p0 = pnand %p4680_p13, %p240_p11 }
  0x28   : > { %s246_s7 = sand.u32 (!%p241_p0), 1, %s4019_s19   ;;  %p4681_p7 = scmp.ne.s32.totalorder (!%p241_p0), %s4678_s27, 0 }
  0x29   : > { %244 = sbr.rel (%p241_p0) target bundleno = 2255 (0x8cf), region = 40  ;;  %s3402_s9 = sshll.u32 (!%p241_p0), %s246_s7, 9 }
  0x2a   : > { %s247_s13 = scalar_lea.sflag (!%p241_p0), [#allocation3], %s246_s7  ;;  %s4144_s14 = scalar_lea.vmem (!%p241_p0), [#allocation2], %s3402_s9 }
  0x2e   : > { %4010 = dma.done.wait (%p4681_p7), %s247_s13, 8192  }
  0x2f   : > { %4012 = vsyncadd (%p4681_p7), %s247_s13, 4294959104  ;;  %p292_p8 = scmp.lt.s32.totalorder %s4084_s22, 2  ;;  %v4032_v0 = vmov 0   ;;  %v379_v1 = vld [vmem:[%s4144_s14 + $0x1c0] sm:$0xff]  ;;  %v380_v14 = vld [vmem:[%s4144_s14 + $0x1c8] sm:$0xff]  ;;  %vm4034_vm0 = vmmov 0  }
  0x30   : > { %811 = vmatprep.mubr.bf16.mxu0 %v4032_v0  ;;  %886 = vmatprep.mubr.bf16.mxu1 %v4032_v0  ;;  %v383_v2 = vld [vmem:[%s4144_s14 + $0x1e0] sm:$0xff]  ;;  %v384_v15 = vld [vmem:[%s4144_s14 + $0x1e8] sm:$0xff]  ;;  %v381_v56 = vld [vmem:[%s4144_s14 + $0x1d0] sm:$0xff]  ;;  %vm1329_vm1 = vcmask 122880   ;;  %vm1345_vm2 = vcmask 130048   ;;  %vm2924_vm3 = vcmask 1040384  }
  0x31   : > { %s4687_s22 = smov (!%p292_p8, %s4084_s22), 2  ;;  %v371_v3 = vld [vmem:[%s4144_s14 + $0x180] sm:$0xff]  ;;  %v3469_v4 = vcombine.high %v379_v1, %v383_v2  ;;  %v3468_v5 = vcombine.low %v379_v1, %v383_v2  ;;  %v372_v16 = vld [vmem:[%s4144_s14 + $0x188] sm:$0xff]  ;;  %v3471_v18 = vcombine.high %v380_v14, %v384_v15  ;;  %v3470_v19 = vcombine.low %v380_v14, %v384_v15  ;;  %v385_v57 = vld [vmem:[%s4144_s14 + $0x1f0] sm:$0xff] }
  0x32   : > { %s3808_s21 = smul.u32 40, %s4687_s22  ;;  %v375_v6 = vld [vmem:[%s4144_s14 + $0x1a0] sm:$0xff]  ;;  %v376_v20 = vld [vmem:[%s4144_s14 + $0x1a8] sm:$0xff]  ;;  %s3523_s11 = sshll.u32 %s4687_s22, 8  ;;  %v3473_v2 = vcombine.high %v381_v56, %v385_v57 }
  0x33   : > { %v3461_v7 = vcombine.high %v371_v3, %v375_v6  ;;  %v363_v8 = vld [vmem:[%s4144_s14 + $0x140] sm:$0xff]  ;;  %779 = vmatprep.subr.bf16.mxu0 %v3469_v4  ;;  %v3460_v10 = vcombine.low %v371_v3, %v375_v6  ;;  %v3463_v22 = vcombine.high %v372_v16, %v376_v20  ;;  %v364_v23 = vld [vmem:[%s4144_s14 + $0x148] sm:$0xff]  ;;  %854 = vmatprep.subr.bf16.mxu1 %v3471_v18  ;;  %s4194_s16 = scalar_lea.vmem %s4674_s3, %s3523_s11  ;;  %v373_v3 = vld [vmem:[%s4144_s14 + $0x190] sm:$0xff]  ;;  %s3404_s17 = sshll.u32 %s4687_s22, 3 }
  0x34   : > { %v367_v9 = vld [vmem:[%s4144_s14 + $0x160] sm:$0xff]  ;;  %780 = vmatpush1.bf16.msra.mxu0 %v3468_v5  ;;  %s4166_s10 = scalar_lea.vmem %s4671_s0, %s3808_s21  ;;  %v368_v24 = vld [vmem:[%s4144_s14 + $0x168] sm:$0xff]  ;;  %855 = vmatpush1.bf16.msra.mxu1 %v3470_v19  ;;  %v3462_v27 = vcombine.low %v372_v16, %v376_v20  ;;  %v377_v4 = vld [vmem:[%s4144_s14 + $0x1b0] sm:$0xff]  ;;  %s300_s25 = scalar_lea.vmem %s4673_s2, %s3404_s17 }
  0x35   : > { %781 = vmatprep.subr.bf16.mxu0 %v3461_v7  ;;  %v3453_v11 = vcombine.high %v363_v8, %v367_v9  ;;  %v355_v12 = vld [vmem:[%s4144_s14 + $0x100] sm:$0xff]  ;;  %v3452_v17 = vcombine.low %v363_v8, %v367_v9  ;;  %856 = vmatprep.subr.bf16.mxu1 %v3463_v22  ;;  %v3455_v29 = vcombine.high %v364_v23, %v368_v24  ;;  %v356_v31 = vld [vmem:[%s4144_s14 + $0x108] sm:$0xff]  ;;  %v382_v6 = vld [vmem:[%s4144_s14 + $0x1d8] sm:$0xff]  ;;  %s308_s30 = scalar_lea.vmem %s4675_s4, %s4687_s22  ;;  %s311_s9 = scalar_lea.vmem %s4676_s5, %s4687_s22 }
  0x36   : > { %v359_v13 = vld [vmem:[%s4144_s14 + $0x120] sm:$0xff]  ;;  %v360_v32 = vld [vmem:[%s4144_s14 + $0x128] sm:$0xff]  ;;  %v3454_v35 = vcombine.low %v364_v23, %v368_v24  ;;  %v386_v7 = vld [vmem:[%s4144_s14 + $0x1f8] sm:$0xff]  ;;  %v3472_v9 = vcombine.low %v381_v56, %v385_v57  ;;  %v3464_v18 = vcombine.low %v373_v3, %v377_v4 }
  0x37   : > { %v3445_v21 = vcombine.high %v355_v12, %v359_v13  ;;  %v347_v25 = vld [vmem:[%s4144_s14 + $0xc0] sm:$0xff]  ;;  %v3444_v28 = vcombine.low %v355_v12, %v359_v13  ;;  %v3447_v37 = vcombine.high %v356_v31, %v360_v32  ;;  %v348_v39 = vld [vmem:[%s4144_s14 + $0xc8] sm:$0xff]  ;;  %v3446_v43 = vcombine.low %v356_v31, %v360_v32  ;;  %v374_v16 = vld [vmem:[%s4144_s14 + $0x198] sm:$0xff] }
  0x38   : > { %782 = vmatpush1.bf16.msra.mxu0 %v3460_v10  ;;  %v351_v26 = vld [vmem:[%s4144_s14 + $0xe0] sm:$0xff]  ;;  %857 = vmatpush1.bf16.msra.mxu1 %v3462_v27  ;;  %v352_v40 = vld [vmem:[%s4144_s14 + $0xe8] sm:$0xff]  ;;  %v365_v10 = vld [vmem:[%s4144_s14 + $0x150] sm:$0xff]  ;;  %v3465_v13 = vcombine.high %v373_v3, %v377_v4  ;;  %v3475_v15 = vcombine.high %v382_v6, %v386_v7  ;;  %v3474_v22 = vcombine.low %v382_v6, %v386_v7 }
  0x39   : > { %783 = vmatprep.subr.bf16.mxu0 %v3453_v11  ;;  %v3437_v30 = vcombine.high %v347_v25, %v351_v26  ;;  %v339_v33 = vld [vmem:[%s4144_s14 + $0x80] sm:$0xff]  ;;  %v3436_v36 = vcombine.low %v347_v25, %v351_v26  ;;  %858 = vmatprep.subr.bf16.mxu1 %v3455_v29  ;;  %v3439_v45 = vcombine.high %v348_v39, %v352_v40  ;;  %v340_v47 = vld [vmem:[%s4144_s14 + $0x88] sm:$0xff]  ;;  %v369_v11 = vld [vmem:[%s4144_s14 + $0x170] sm:$0xff] }
  0x3a   : > { %v343_v34 = vld [vmem:[%s4144_s14 + $0xa0] sm:$0xff]  ;;  %v344_v48 = vld [vmem:[%s4144_s14 + $0xa8] sm:$0xff]  ;;  %v3438_v51 = vcombine.low %v348_v39, %v352_v40  ;;  %v357_v19 = vld [vmem:[%s4144_s14 + $0x110] sm:$0xff]  ;;  %v3456_v25 = vcombine.low %v365_v10, %v369_v11 }
  0x3b   : > { %v3429_v38 = vcombine.high %v339_v33, %v343_v34  ;;  %v331_v41 = vld [vmem:[%s4144_s14 + $0x40] sm:$0xff]  ;;  %v3428_v44 = vcombine.low %v339_v33, %v343_v34  ;;  %v332_v52 = vld [vmem:[%s4144_s14 + $0x48] sm:$0xff]  ;;  %v3431_v55 = vcombine.high %v340_v47, %v344_v48  ;;  %v3430_v59 = vcombine.low %v340_v47, %v344_v48  ;;  %v361_v20 = vld [vmem:[%s4144_s14 + $0x130] sm:$0xff] }
  0x3c   : > { %784 = vmatpush1.bf16.msra.mxu0 %v3452_v17  ;;  %v335_v42 = vld [vmem:[%s4144_s14 + $0x60] sm:$0xff]  ;;  %859 = vmatpush1.bf16.msra.mxu1 %v3454_v35  ;;  %v336_v53 = vld [vmem:[%s4144_s14 + $0x68] sm:$0xff]  ;;  %v378_v17 = vld [vmem:[%s4144_s14 + $0x1b8] sm:$0xff]  ;;  %v3448_v32 = vcombine.low %v357_v19, %v361_v20 }
  0x3d   : > { %785 = vmatprep.subr.bf16.mxu0 %v3445_v21  ;;  %860 = vmatprep.subr.bf16.mxu1 %v3447_v37  ;;  %v3421_v46 = vcombine.high %v331_v41, %v335_v42  ;;  %v323_v49 = vld [vmem:[%s4144_s14] sm:$0xff]  ;;  %v3420_v54 = vcombine.low %v331_v41, %v335_v42  ;;  %v324_v60 = vld [vmem:[%s4144_s14 + $0x8] sm:$0xff]  ;;  %v3423_v63 = vcombine.high %v332_v52, %v336_v53  ;;  %v366_v23 = vld [vmem:[%s4144_s14 + $0x158] sm:$0xff] }
  0x3e   : > { %v327_v50 = vld [vmem:[%s4144_s14 + $0x20] sm:$0xff]  ;;  %v328_v61 = vld [vmem:[%s4144_s14 + $0x28] sm:$0xff]  ;;  %v3422_v5 = vcombine.low %v332_v52, %v336_v53  ;;  %v3457_v21 = vcombine.high %v365_v10, %v369_v11  ;;  %v370_v24 = vld [vmem:[%s4144_s14 + $0x178] sm:$0xff]  ;;  %v3467_v26 = vcombine.high %v374_v16, %v378_v17  ;;  %v3466_v31 = vcombine.low %v374_v16, %v378_v17 }
  0x3f   : > { %v3413_v58 = vcombine.high %v323_v49, %v327_v50  ;;  %v3412_v62 = vcombine.low %v323_v49, %v327_v50  ;;  %v4203_v1 = vld [vmem:[%s4166_s10] sm:$0xff]   ;;  %v3415_v8 = vcombine.high %v324_v60, %v328_v61  ;;  %v4212_v12 = vld [vmem:[%s4166_s10 + $0x8] sm:$0xff]   ;;  %v3414_v14 = vcombine.low %v324_v60, %v328_v61  ;;  %v349_v27 = vld [vmem:[%s4144_s14 + $0xd0] sm:$0xff] }
  0x40   : > { %786 = vmatpush1.bf16.msra.mxu0 %v3444_v28  ;;  %861 = vmatpush1.bf16.msra.mxu1 %v3446_v43  ;;  %v353_v28 = vld [vmem:[%s4144_s14 + $0xf0] sm:$0xff]  ;;  %v3459_v33 = vcombine.high %v366_v23, %v370_v24  ;;  %v358_v35 = vld [vmem:[%s4144_s14 + $0x118] sm:$0xff]  ;;  %v3458_v39 = vcombine.low %v366_v23, %v370_v24  ;;  %v1080_v10 = vunpack.c.h.bf16 %v4212_v12  ;;  %v389_v17 = vlaneseq }
  0x41   : > { %787 = vmatprep.subr.bf16.mxu0 %v3437_v30  ;;  %862 = vmatprep.subr.bf16.mxu1 %v3439_v45  ;;  %v4225_v29 = vld [vmem:[%s4166_s10 + $0x10] sm:$0xff]   ;;  %v3449_v30 = vcombine.high %v357_v19, %v361_v20  ;;  %v3441_v34 = vcombine.high %v349_v27, %v353_v28  ;;  %v3440_v40 = vcombine.low %v349_v27, %v353_v28  ;;  %v350_v43 = vld [vmem:[%s4144_s14 + $0xd8] sm:$0xff] }
  0x42   : > { %v341_v37 = vld [vmem:[%s4144_s14 + $0x90] sm:$0xff]  ;;  %v4244_v47 = vld [vmem:[%s4166_s10 + $0x18] sm:$0xff]  }
  0x43   : > { %v333_v45 = vld [vmem:[%s4144_s14 + $0x50] sm:$0xff]  ;;  %v342_v52 = vld [vmem:[%s4144_s14 + $0x98] sm:$0xff]  ;;  %v1083_v20 = vunpack.c.l.bf16 %v4244_v47 }
  0x44   : > { %788 = vmatpush1.bf16.msra.mxu0 %v3436_v36  ;;  %863 = vmatpush1.bf16.msra.mxu1 %v3438_v51  ;;  %v362_v36 = vld [vmem:[%s4144_s14 + $0x138] sm:$0xff] }
  0x45   : > { %789 = vmatprep.subr.bf16.mxu0 %v3429_v38  ;;  %864 = vmatprep.subr.bf16.mxu1 %v3431_v55  ;;  %v345_v38 = vld [vmem:[%s4144_s14 + $0xb0] sm:$0xff]  ;;  %v3451_v41 = vcombine.high %v358_v35, %v362_v36  ;;  %v3450_v48 = vcombine.low %v358_v35, %v362_v36  ;;  %v346_v53 = vld [vmem:[%s4144_s14 + $0xb8] sm:$0xff] }
  0x46   : > { %v3433_v42 = vcombine.high %v341_v37, %v345_v38  ;;  %v3432_v49 = vcombine.low %v341_v37, %v345_v38  ;;  %v329_v55 = vld [vmem:[%s4144_s14 + $0x30] sm:$0xff]  ;;  %v334_v60 = vld [vmem:[%s4144_s14 + $0x58] sm:$0xff] }
  0x47   : > { %v338_v61 = vld [vmem:[%s4144_s14 + $0x78] sm:$0xff] }
  0x48   : > { %790 = vmatpush1.bf16.msra.mxu0 %v3428_v44  ;;  %865 = vmatpush1.bf16.msra.mxu1 %v3430_v59  ;;  %v354_v44 = vld [vmem:[%s4144_s14 + $0xf8] sm:$0xff]  ;;  %v3426_v6 = vcombine.low %v334_v60, %v338_v61 }
  0x49   : > { %791 = vmatprep.subr.bf16.mxu0 %v3421_v46  ;;  %866 = vmatprep.subr.bf16.mxu1 %v3423_v63  ;;  %v337_v46 = vld [vmem:[%s4144_s14 + $0x70] sm:$0xff]  ;;  %v3443_v50 = vcombine.high %v350_v43, %v354_v44  ;;  %v3442_v56 = vcombine.low %v350_v43, %v354_v44  ;;  %v326_v3 = vld [vmem:[%s4144_s14 + $0x18] sm:$0xff] }
  0x4a   : > { %v3425_v51 = vcombine.high %v333_v45, %v337_v46  ;;  %v3424_v57 = vcombine.low %v333_v45, %v337_v46  ;;  %v330_v4 = vld [vmem:[%s4144_s14 + $0x38] sm:$0xff] }
  0x4b   : > { %v3419_v7 = vcombine.high %v326_v3, %v330_v4 }
  0x4c   : > { %792 = vmatpush1.bf16.msra.mxu0 %v3420_v54  ;;  %867 = vmatpush1.bf16.msra.mxu1 %v3422_v5  ;;  %v325_v54 = vld [vmem:[%s4144_s14 + $0x10] sm:$0xff]  ;;  %v3857_v5 = vld [vmem:[%s4166_s10 + $0x20] sm:$0xff]  }
  0x4d   : > { %793 = vmatprep.subr.bf16.mxu0 %v3413_v58  ;;  %868 = vmatprep.subr.bf16.mxu1 %v3415_v8  ;;  %v3435_v58 = vcombine.high %v342_v52, %v346_v53  ;;  %v3417_v59 = vcombine.high %v325_v54, %v329_v55  ;;  %v3416_v63 = vcombine.low %v325_v54, %v329_v55 }
  0x4e   : > { %v3418_v8 = vcombine.low %v326_v3, %v330_v4 }
  0x50   : > { %794 = vmatpush1.bf16.msra.mxu0 %v3412_v62  ;;  %869 = vmatpush1.bf16.msra.mxu1 %v3414_v14  ;;  %v3434_v62 = vcombine.low %v342_v52, %v346_v53  ;;  %v1081_v14 = vunpack.c.l.bf16 %v4225_v29 }
  0x51   : > { %929 = vmatprep.subr.bf16.mxu0 %v3473_v2  ;;  %1004 = vmatprep.subr.bf16.mxu1 %v3475_v15  ;;  %v3427_v2 = vcombine.high %v334_v60, %v338_v61  ;;  %v1082_v15 = vunpack.c.h.bf16 %v4225_v29 }
  0x53   : > { %812 = vmatmul.mubr.bf16.vlgmr.msra.gmra.mxu0 %v4203_v1  ;;  %887 = vmatmul.mubr.bf16.vlgmr.msra.gmra.mxu1 %v4203_v1  ;;  %v1092_v16 = vadd.f32 %v1082_v15, %v1081_v14 }
  0x54   : > { %821 = vmatprep.mubr.bf16.mxu0 %v4032_v0  ;;  %930 = vmatpush1.bf16.msra.mxu0 %v3472_v9  ;;  %v1079_v9 = vunpack.c.l.bf16 %v4212_v12 }
  0x55   : > { %931 = vmatprep.subr.bf16.mxu0 %v3465_v13  ;;  %892 = vmatprep.mubr.bf16.mxu1 %v4032_v0  ;;  %v1093_v19 = vrot.slane %v1092_v16, 4 }
  0x56   : > { %1005 = vmatpush1.bf16.msra.mxu1 %v3474_v22  ;;  %v1085_v11 = vadd.f32 %v1080_v10, %v1079_v9  ;;  %v4292_v22 = vshrl.u32 %v389_v17, 7 }
  0x57   : > { %1006 = vmatprep.subr.bf16.mxu1 %v3467_v26  ;;  %v4298_v26 = vld [vmem:[%s300_s25] sm:$0xff] }
  0x58   : > { %932 = vmatpush1.bf16.msra.mxu0 %v3464_v18  ;;  %v1086_v13 = vrot.slane %v1085_v11, 4 }
  0x59   : > { %933 = vmatprep.subr.bf16.mxu0 %v3457_v21  ;;  %v1084_v21 = vunpack.c.h.bf16 %v4244_v47 }
  0x5a   : > { %1007 = vmatpush1.bf16.msra.mxu1 %v3466_v31 }
  0x5b   : > { %822 = vmatmul.mubr.bf16.gmra.mxu0 %v4212_v12  ;;  %1008 = vmatprep.subr.bf16.mxu1 %v3459_v33  ;;  %v1099_v23 = vadd.f32 %v1084_v21, %v1083_v20 }
  0x5c   : > { %831 = vmatprep.mubr.bf16.mxu0 %v4032_v0  ;;  %934 = vmatpush1.bf16.msra.mxu0 %v3456_v25  ;;  %v391_v25 = vsub.s32 0, %v4292_v22 }
  0x5d   : > { %935 = vmatprep.subr.bf16.mxu0 %v3449_v30  ;;  %893 = vmatmul.mubr.bf16.gmra.mxu1 %v4212_v12 }
  0x5e   : > { %898 = vmatprep.mubr.bf16.mxu1 %v4032_v0  ;;  %1009 = vmatpush1.bf16.msra.mxu1 %v3458_v39 }
  0x5f   : > { %1010 = vmatprep.subr.bf16.mxu1 %v3451_v41 }
  0x60   : > { %936 = vmatpush1.bf16.msra.mxu0 %v3448_v32  ;;  %v392_v32 = vrot.slane %v4298_v26, %v391_v25 }
  0x61   : > { %937 = vmatprep.subr.bf16.mxu0 %v3441_v34  ;;  %v395_v34 = vsub.s32 1, %v4292_v22 }
  0x62   : > { %1011 = vmatpush1.bf16.msra.mxu1 %v3450_v48 }
  0x63   : > { %832 = vmatmul.mubr.bf16.gmra.mxu0 %v4225_v29  ;;  %1012 = vmatprep.subr.bf16.mxu1 %v3443_v50  ;;  %v396_v43 = vrot.slane %v4298_v26, %v395_v34 }
  0x64   : > { %841 = vmatprep.mubr.bf16.mxu0 %v4032_v0  ;;  %938 = vmatpush1.bf16.msra.mxu0 %v3440_v40 }
  0x65   : > { %939 = vmatprep.subr.bf16.mxu0 %v3433_v42  ;;  %899 = vmatmul.mubr.bf16.gmra.mxu1 %v4225_v29 }
  0x66   : > { %908 = vmatprep.mubr.bf16.mxu1 %v4032_v0  ;;  %1013 = vmatpush1.bf16.msra.mxu1 %v3442_v56 }
  0x67   : > { %1014 = vmatprep.subr.bf16.mxu1 %v3435_v58 }
  0x68   : > { %940 = vmatpush1.bf16.msra.mxu0 %v3432_v49 }
  0x69   : > { %941 = vmatprep.subr.bf16.mxu0 %v3425_v51 }
  0x6a   : > { %1015 = vmatpush1.bf16.msra.mxu1 %v3434_v62 }
  0x6b   : > { %842 = vmatmul.mubr.bf16.gmra.mxu0 %v4244_v47  ;;  %1016 = vmatprep.subr.bf16.mxu1 %v3427_v2 }
  0x6c   : > { %847 = vmatprep.mubr.bf16.mxu0 %v4032_v0  ;;  %942 = vmatpush1.bf16.msra.mxu0 %v3424_v57 }
  0x6d   : > { %943 = vmatprep.subr.bf16.mxu0 %v3417_v59  ;;  %909 = vmatmul.mubr.bf16.gmra.mxu1 %v4244_v47 }
  0x6e   : > { %918 = vmatprep.mubr.bf16.mxu1 %v4032_v0  ;;  %1017 = vmatpush1.bf16.msra.mxu1 %v3426_v6 }
  0x6f   : > { %1018 = vmatprep.subr.bf16.mxu1 %v3419_v7 }
  0x70   : > { %944 = vmatpush1.bf16.msra.mxu0 %v3416_v63 }
  0x72   : > { %1019 = vmatpush1.bf16.msra.mxu1 %v3418_v8 }
  0x73   : > { %848 = vmatmul.mubr.bf16.gmra.mxu0 %v3857_v5 }
  0x74   : > { %961 = vmatprep.mubr.bf16.mxu0 %v4032_v0 }
  0x75   : > { %919 = vmatmul.mubr.bf16.gmra.mxu1 %v3857_v5 }
  0x76   : > { %1036 = vmatprep.mubr.bf16.mxu1 %v4032_v0 }
  0x7b   : > { %962 = vmatmul.mubr.bf16.vlgmr.msra.gmra.mxu0 %v4203_v1 }
  0x7c   : > { %967 = vmatprep.mubr.bf16.mxu0 %v4032_v0 }
  0x7d   : > { %1037 = vmatmul.mubr.bf16.vlgmr.msra.gmra.mxu1 %v4203_v1  ;;  %v4033_v1 = vmov 0.0  }
  0x7e   : > { %1042 = vmatprep.mubr.bf16.mxu1 %v4032_v0  ;;  %3640 = vmatprep.subr.mxu0 %v4033_v1 }
  0x7f   : > { %3647 = vmatprep.subr.mxu1 %v4033_v1 }
  0x83   : > { %968 = vmatmul.mubr.bf16.gmra.mxu0 %v4212_v12 }
  0x84   : > { %977 = vmatprep.mubr.bf16.mxu0 %v4032_v0 }
  0x85   : > { %1043 = vmatmul.mubr.bf16.gmra.mxu1 %v4212_v12  ;;  %v1094_v12 = vadd.f32 %v1093_v19, %v1092_v16 }
  0x86   : > { %1052 = vmatprep.mubr.bf16.mxu1 %v4032_v0 }
  0x87   : > { %v1095_v28 = vrot.slane %v1094_v12, 2 }
  0x89   : > { %v1096_v38 = vadd.f32 %v1095_v28, %v1094_v12 }
  0x8b   : > { %978 = vmatmul.mubr.bf16.gmra.mxu0 %v4225_v29 }
  0x8c   : > { %987 = vmatprep.mubr.bf16.mxu0 %v4032_v0 }
  0x8d   : > { %1053 = vmatmul.mubr.bf16.gmra.mxu1 %v4225_v29  ;;  %v1100_v29 = vrot.slane %v1099_v23, 4 }
  0x8e   : > { %1062 = vmatprep.mubr.bf16.mxu1 %v4032_v0 }
  0x8f   : > { %v1101_v39 = vadd.f32 %v1100_v29, %v1099_v23 }
  0x91   : > { %v1102_v48 = vrot.slane %v1101_v39, 2 }
  0x93   : > { %988 = vmatmul.mubr.bf16.gmra.mxu0 %v4244_v47  ;;  %v1103_v56 = vadd.f32 %v1102_v48, %v1101_v39 }
  0x94   : > { %997 = vmatprep.mubr.bf16.mxu0 %v4032_v0 }
  0x95   : > { %1063 = vmatmul.mubr.bf16.gmra.mxu1 %v4244_v47  ;;  %v1097_v47 = vrot.slane %v1096_v38, 1  ;;  %v1104_v2 = vrot.slane %v1103_v56, 1 }
  0x96   : > { %1072 = vmatprep.mubr.bf16.mxu1 %v4032_v0  ;;  %v1087_v0 = vadd.f32 %v1086_v13, %v1085_v11 }
  0x97   : > { %v1098_v55 = vadd.f32 %v1097_v47, %v1096_v38  ;;  %v1105_v8 = vadd.f32 %v1104_v2, %v1103_v56  ;;  %v419_v2 = vsub.s32 7, %v4292_v22 }
  0x98   : > { %v1088_v18 = vrot.slane %v1087_v0, 2 }
  0x99   : > { %v4315_v63 = vmul.f32 0.0625, %v1098_v55 }
  0x9a   : > { %v1089_v24 = vadd.f32 %v1088_v18, %v1087_v0  ;;  %v4327_v0 = vmul.f32 0.0625, %v1105_v8  ;;  %v403_v18 = vsub.s32 3, %v4292_v22  ;;  %v4396_v8 = vrot.slane %v4298_v26, %v419_v2 }
  0x9b   : > { %998 = vmatmul.mubr.bf16.gmra.mxu0 %v3857_v5 }
  0x9c   : > { %3644 = vmatprep.mubr.msk.f32.mxu0 %vm4034_vm0, %v4033_v1  ;;  %v1090_v31 = vrot.slane %v1089_v24, 1  ;;  %v4343_v25 = vrot.slane %v4298_v26, %v403_v18 }
  0x9d   : > { %1073 = vmatmul.mubr.bf16.gmra.mxu1 %v3857_v5 }
  0x9e   : > { %3651 = vmatprep.mubr.msk.f32.mxu1 %vm4034_vm0, %v4033_v1  ;;  %v1091_v37 = vadd.f32 %v1090_v31, %v1089_v24 }
  0xa0   : > { %v4304_v46 = vmul.f32 0.0625, %v1091_v37 }
 0x113   : > { %v813_v27 = vpop.f32.mrf.mxu0  ;;  %v888_v40 = vpop.f32.mrf.mxu1 }
 0x114   : > { %v814_v42 = vadd.f32 %v813_v27, %v392_v32 }
 0x115   : > { %v815_v30 = vpop.f32.mrf.mxu0  ;;  %v889_v44 = vpop.f32.mrf.mxu1 }
 0x116   : > { %v816_v10 = vadd.f32 %v815_v30, %v396_v43 }
 0x117   : > { %v817_v33 = vpop.f32.mrf.mxu0  ;;  %v890_v50 = vpop.f32.mrf.mxu1 }
 0x118   : > { %v818_v35 = vadd.f32 %v817_v33, %v392_v32 }
 0x119   : > { %v819_v36 = vpop.f32.mrf.mxu0  ;;  %v891_v53 = vpop.f32.mrf.mxu1 }
 0x11a   : > { %3641 = vmatpush3.xpose.msra.mxu0 %v818_v35  ;;  %v820_v5 = vadd.f32 %v819_v36, %v396_v43 }
 0x11b   : > { %v823_v41 = vpop.f32.mrf.mxu0  ;;  %3642 = vmatprep.subr.mxu0 %v4033_v1 }
 0x11c   : > { %v824_v60 = vadd.f32 %v823_v41, %v392_v32 }
 0x11d   : > { %v825_v45 = vpop.f32.mrf.mxu0  ;;  %v894_v58 = vpop.f32.mrf.mxu1 }
 0x11e   : > { %v4306_v49 = vadd.f32 %v825_v45, %v396_v43  ;;  %3643 = vmatpush3.xpose.msra.mxu0 %v814_v42 }
 0x11f   : > { %v827_v51 = vpop.f32.mrf.mxu0  ;;  %3654 = vmatprep.subr.mxu0 %v4033_v1  ;;  %v895_v61 = vpop.f32.mrf.mxu1 }
 0x120   : > { %v828_v52 = vadd.f32 %v827_v51, %v392_v32 }
 0x121   : > { %v829_v54 = vpop.f32.mrf.mxu0  ;;  %3645 = vmatmul.mubr.f32.vlgmr.msra.gmra.mxu0 %v4304_v46  ;;  %v896_v3 = vpop.f32.mrf.mxu1 }
 0x122   : > { %v4310_v57 = vadd.f32 %v829_v54, %v396_v43  ;;  %3648 = vmatpush3.xpose.msra.mxu1 %v828_v52  ;;  %3658 = vmatprep.mubr.msk.f32.mxu0 %vm4034_vm0, %v4033_v1  ;;  %v411_v52 = vsub.s32 5, %v4292_v22 }
 0x123   : > { %v833_v59 = vpop.f32.mrf.mxu0  ;;  %3649 = vmatprep.subr.mxu1 %v4033_v1  ;;  %v897_v7 = vpop.f32.mrf.mxu1 }
 0x124   : > { %v834_v14 = vadd.f32 %v833_v59, %v392_v32  ;;  %v4376_v58 = vrot.slane %v4298_v26, %v411_v52 }
 0x125   : > { %v835_v62 = vpop.f32.mrf.mxu0  ;;  %v4319_v11 = vpop.f32.mrf.mxu1 }
 0x126   : > { %3650 = vmatpush3.xpose.msra.mxu1 %v824_v60  ;;  %v836_v23 = vadd.f32 %v835_v62, %v396_v43 }
 0x127   : > { %v837_v4 = vpop.f32.mrf.mxu0  ;;  %3661 = vmatprep.subr.mxu1 %v4033_v1  ;;  %v4323_v15 = vpop.f32.mrf.mxu1 }
 0x128   : > { %v838_v6 = vadd.f32 %v837_v4, %v392_v32 }
 0x129   : > { %3652 = vmatmul.mubr.f32.vlgmr.msra.gmra.mxu1 %v4315_v63  ;;  %v839_v9 = vpop.f32.mrf.mxu0  ;;  %v4330_v17 = vpop.f32.mrf.mxu1 }
 0x12a   : > { %3655 = vmatpush3.xpose.msra.mxu0 %v838_v6  ;;  %3662 = vmatpush3.msra.mxu1 %v820_v5  ;;  %v840_v20 = vadd.f32 %v839_v9, %v396_v43 }
 0x12b   : > { %3663 = vmatprep.subr.mxu1 %v4033_v1  ;;  %3656 = vmatprep.subr.mxu0 %v4033_v1  ;;  %v843_v13 = vpop.f32.mrf.mxu0  ;;  %v4334_v21 = vpop.f32.mrf.mxu1 }
 0x12c   : > { %3664 = vmatpush3.msra.mxu1 %v816_v10  ;;  %3665 = vmatprep.mubr.msk.f32.mxu1 %vm4034_vm0, %v4033_v1 }
 0x12d   : > { %v844_v16 = vpop.f32.mrf.mxu0  ;;  %3668 = vmatprep.subr.mxu1 %v4033_v1  ;;  %v4337_v24 = vpop.f32.mrf.mxu1 }
 0x12e   : > { %3657 = vmatpush3.xpose.msra.mxu0 %v834_v14 }
 0x12f   : > { %3675 = vmatprep.subr.mxu0 %v4033_v1  ;;  %v845_v19 = vpop.f32.mrf.mxu0  ;;  %v912_v28 = vpop.f32.mrf.mxu1 }
 0x130   : > { %v4346_v30 = vadd.f32 %v912_v28, %v4343_v25 }
 0x131   : > { %3659 = vmatmul.mubr.f32.vlgmr.msra.gmra.mxu0 %v4327_v0  ;;  %v846_v12 = vpop.f32.mrf.mxu0  ;;  %v4349_v31 = vpop.f32.mrf.mxu1 }
 0x132   : > { %3676 = vmatpush3.msra.mxu0 %v840_v20  ;;  %3679 = vmatprep.mubr.msk.f32.mxu0 %vm4034_vm0, %v4033_v1 }
 0x133   : > { %3677 = vmatprep.subr.mxu0 %v4033_v1  ;;  %v849_v27 = vpop.f32.mrf.mxu0  ;;  %v916_v33 = vpop.f32.mrf.mxu1 }
 0x134   : > { %3678 = vmatpush3.msra.mxu0 %v836_v23  ;;  %v4352_v35 = vadd.f32 %v916_v33, %v4343_v25 }
 0x135   : > { %v850_v29 = vpop.f32.mrf.mxu0  ;;  %3689 = vmatprep.subr.mxu0 %v4033_v1  ;;  %v4354_v36 = vpop.f32.mrf.mxu1 }
 0x137   : > { %v851_v32 = vpop.f32.mrf.mxu0  ;;  %v4356_v38 = vpop.f32.mrf.mxu1 }
 0x139   : > { %v852_v34 = vpop.f32.mrf.mxu0  ;;  %v4358_v40 = vpop.f32.mrf.mxu1 }
 0x13b   : > { %v963_v37 = vpop.f32.mrf.mxu0  ;;  %v4360_v42 = vpop.f32.mrf.mxu1 }
 0x13d   : > { %v964_v39 = vpop.f32.mrf.mxu0  ;;  %v1038_v44 = vpop.f32.mrf.mxu1 }
 0x13f   : > { %v965_v41 = vpop.f32.mrf.mxu0  ;;  %v1039_v47 = vpop.f32.mrf.mxu1 }
 0x141   : > { %v966_v43 = vpop.f32.mrf.mxu0  ;;  %v1040_v50 = vpop.f32.mrf.mxu1 }
 0x143   : > { %v4362_v45 = vpop.f32.mrf.mxu0  ;;  %v1041_v53 = vpop.f32.mrf.mxu1 }
 0x145   : > { %v4364_v48 = vpop.f32.mrf.mxu0  ;;  %v4371_v55 = vpop.f32.mrf.mxu1 }
 0x147   : > { %v4366_v51 = vpop.f32.mrf.mxu0  ;;  %v4378_v59 = vpop.f32.mrf.mxu1 }
 0x149   : > { %v4369_v54 = vpop.f32.mrf.mxu0  ;;  %v4383_v62 = vpop.f32.mrf.mxu1 }
 0x14b   : > { %v4373_v56 = vpop.f32.mrf.mxu0  ;;  %v4388_v4 = vpop.f32.mrf.mxu1 }
 0x14d   : > { %v981_v60 = vpop.f32.mrf.mxu0  ;;  %v4393_v7 = vpop.f32.mrf.mxu1 }
 0x14e   : > { %v4381_v61 = vadd.f32 %v981_v60, %v4376_v58 }
 0x14f   : > { %v4386_v3 = vpop.f32.mrf.mxu0  ;;  %v1056_v10 = vpop.f32.mrf.mxu1 }
 0x150   : > { %v4403_v14 = vadd.f32 %v1056_v10, %v4396_v8 }
 0x151   : > { %v985_v5 = vpop.f32.mrf.mxu0  ;;  %v4405_v16 = vpop.f32.mrf.mxu1 }
 0x152   : > { %v4391_v6 = vadd.f32 %v985_v5, %v4376_v58 }
 0x153   : > { %v4398_v9 = vpop.f32.mrf.mxu0  ;;  %v1060_v19 = vpop.f32.mrf.mxu1 }
 0x154   : > { %v4412_v12 = vadd.f32 %v1060_v19, %v4396_v8 }
 0x155   : > { %v4400_v13 = vpop.f32.mrf.mxu0  ;;  %v4414_v23 = vpop.f32.mrf.mxu1 }
 0x157   : > { %v4407_v18 = vpop.f32.mrf.mxu0  ;;  %v4416_v28 = vpop.f32.mrf.mxu1 }
 0x159   : > { %v4409_v20 = vpop.f32.mrf.mxu0  ;;  %v4418_v32 = vpop.f32.mrf.mxu1 }
 0x15b   : > { %v999_v27 = vpop.f32.mrf.mxu0  ;;  %v4420_v34 = vpop.f32.mrf.mxu1 }
 0x15d   : > { %v1000_v29 = vpop.f32.mrf.mxu0  ;;  %v1074_v39 = vpop.f32.mrf.mxu1 }
 0x15f   : > { %v1001_v33 = vpop.f32.mrf.mxu0  ;;  %v1075_v41 = vpop.f32.mrf.mxu1 }
 0x161   : > { %v1002_v37 = vpop.f32.mrf.mxu0  ;;  %v1076_v43 = vpop.f32.mrf.mxu1 }
 0x163   : > { %v1077_v44 = vpop.f32.mrf.mxu1 }
 0x1e1   : > { %v1176_v47 = vpop.f32.mrf.mxu0 }
 0x1e2   : > { %3893 = vtanh.f32 %v1176_v47 }
 0x1e3   : > { %v3646_v50 = vpop.f32.mrf.mxu0 }
 0x1e9   : > { %v1246_v52 = vpop.f32.mrf.mxu1 }
 0x1ea   : > { %3895 = vtanh.f32 %v1246_v52 }
 0x1eb   : > { %v3653_v53 = vpop.f32.mrf.mxu1 }
 0x1ef   : > { %v3894_v60 = vpop.eup %3893 }
 0x1f0   : > { %v1323_v2 = vmul.f32 1.442695, %v3894_v60 }
 0x1f1   : > { %v1316_v5 = vpop.f32.mrf.mxu0 }
 0x1f2   : > { %3897 = vpow2.f32 %v1323_v2  ;;  %v399_v2 = vsub.s32 2, %v4292_v22 }
 0x1f3   : > { %3899 = vtanh.f32 %v1316_v5  ;;  %v3660_v10 = vpop.f32.mrf.mxu0 }
 0x1f4   : > { %v400_v10 = vrot.slane %v4298_v26, %v399_v2 }
 0x1f7   : > { %v3896_v19 = vpop.eup %3895 }
 0x1f8   : > { %v1325_v27 = vmul.f32 1.442695, %v3896_v19 }
 0x1fa   : > { %3901 = vpow2.f32 %v1325_v27 }
 0x1ff   : > { %v3898_v29 = vpop.eup %3897 }
 0x200   : > { %v3900_v33 = vpop.eup %3899  ;;  %v1330_v37 = vsel %vm1329_vm1, %v3898_v29, 0.0 }
 0x201   : > { %v1327_v39 = vmul.f32 1.442695, %v3900_v33  ;;  %1331 = vadd.xlane.f32.xlu0 %v1330_v37 }
 0x203   : > { %3903 = vpow2.f32 %v1327_v39  ;;  %v915_v39 = vadd.f32 %v4349_v31, %v400_v10  ;;  %v907_v31 = vadd.f32 %v4334_v21, %v4343_v25 }
 0x207   : > { %v3902_v41 = vpop.eup %3901 }
 0x208   : > { %v1333_v43 = vsel %vm1329_vm1, %v3902_v41, 0.0 }
 0x209   : > { %1334 = vadd.xlane.f32.xlu0 %v1333_v43 }
 0x210   : > { %v3904_v44 = vpop.eup %3903 }
 0x211   : > { %v1336_v47 = vsel %vm1329_vm1, %v3904_v44, 0.0 }
 0x212   : > { %1337 = vadd.xlane.f32.xlu1 %v1336_v47 }
 0x28a   : > { %v1332_v50 = vpop.xlane.xlu0 %1331 }
 0x28b   : > { %3905 = vrcp.f32 %v1332_v50 }
 0x292   : > { %v1335_v52 = vpop.xlane.xlu0 %1334 }
 0x293   : > { %3907 = vrcp.f32 %v1335_v52 }
 0x298   : > { %v3906_v53 = vpop.eup %3905 }
 0x299   : > { %v1342_v60 = vmul.f32 %v3906_v53, %v3898_v29  ;;  %v905_v29 = vadd.f32 %v4330_v17, %v400_v10  ;;  %v921_v17 = vadd.f32 %v4354_v36, %v400_v10  ;;  %v903_v36 = vadd.f32 %v4323_v15, %v4343_v25 }
 0x29b   : > { %v1338_v5 = vpop.xlane.xlu1 %1337  ;;  %3666 = vmatmul.mubr.msk.f32.vlgmr.msra.gmra.mxu1 %vm1345_vm2, %v1342_v60 }
 0x29c   : > { %3909 = vrcp.f32 %v1338_v5  ;;  %3669 = vmatpush3.msra.mxu1 %v4310_v57  ;;  %3672 = vmatprep.mubr.msk.f32.mxu1 %vm4034_vm0, %v4033_v1  ;;  %v901_v57 = vadd.f32 %v4319_v11, %v400_v10  ;;  %v911_v11 = vadd.f32 %v4337_v24, %v400_v10  ;;  %v923_v24 = vadd.f32 %v4356_v38, %v4343_v25 }
 0x29d   : > { %3670 = vmatprep.subr.mxu1 %v4033_v1 }
 0x29e   : > { %3671 = vmatpush3.msra.mxu1 %v4306_v49  ;;  %v925_v49 = vadd.f32 %v4358_v40, %v400_v10 }
 0x29f   : > { %3682 = vmatprep.subr.mxu1 %v4033_v1 }
 0x2a0   : > { %v3908_v19 = vpop.eup %3907 }
 0x2a1   : > { %v1343_v27 = vmul.f32 %v3908_v19, %v3902_v41 }
 0x2a3   : > { %3673 = vmatmul.mubr.msk.f32.vlgmr.msra.gmra.mxu1 %vm1345_vm2, %v1343_v27 }
 0x2a4   : > { %3683 = vmatpush3.xpose.msra.mxu1 %v905_v29  ;;  %3686 = vmatprep.mubr.msk.f32.mxu1 %vm4034_vm0, %v4033_v1 }
 0x2a5   : > { %3684 = vmatprep.subr.mxu1 %v4033_v1 }
 0x2a8   : > { %3685 = vmatpush3.xpose.msra.mxu1 %v901_v57 }
 0x2a9   : > { %v3910_v33 = vpop.eup %3909  ;;  %3696 = vmatprep.subr.mxu1 %v4033_v1 }
 0x2aa   : > { %v1344_v37 = vmul.f32 %v3910_v33, %v3904_v44 }
 0x2ab   : > { %3687 = vmatmul.mubr.f32.vlgmr.msra.gmra.mxu1 %v4304_v46  ;;  %v927_v46 = vadd.f32 %v4360_v42, %v4343_v25 }
 0x2ac   : > { %3680 = vmatmul.mubr.msk.f32.vlgmr.msra.gmra.mxu0 %vm1345_vm2, %v1344_v37  ;;  %3697 = vmatpush3.xpose.msra.mxu1 %v925_v49 }
 0x2ad   : > { %3690 = vmatpush3.xpose.msra.mxu0 %v915_v39  ;;  %3698 = vmatprep.subr.mxu1 %v4033_v1 }
 0x2ae   : > { %3691 = vmatprep.subr.mxu0 %v4033_v1  ;;  %3693 = vmatprep.mubr.msk.f32.mxu0 %vm4034_vm0, %v4033_v1 }
 0x2af   : > { %3700 = vmatprep.mubr.msk.f32.mxu1 %vm4034_vm0, %v4033_v1 }
 0x2b0   : > { %3699 = vmatpush3.xpose.msra.mxu1 %v921_v17 }
 0x2b1   : > { %3692 = vmatpush3.xpose.msra.mxu0 %v911_v11  ;;  %3717 = vmatprep.subr.mxu1 %v4033_v1 }
 0x2b2   : > { %3703 = vmatprep.subr.mxu0 %v4033_v1 }
 0x2b3   : > { %3701 = vmatmul.mubr.f32.vlgmr.msra.gmra.mxu1 %v4327_v0 }
 0x2b4   : > { %3694 = vmatmul.mubr.f32.vlgmr.msra.gmra.mxu0 %v4315_v63  ;;  %3718 = vmatpush3.msra.mxu1 %v927_v46  ;;  %v407_v46 = vsub.s32 4, %v4292_v22 }
 0x2b5   : > { %3704 = vmatpush3.msra.mxu0 %v907_v31  ;;  %3719 = vmatprep.subr.mxu1 %v4033_v1 }
 0x2b6   : > { %3705 = vmatprep.subr.mxu0 %v4033_v1  ;;  %3720 = vmatpush3.msra.mxu1 %v923_v24  ;;  %v408_v31 = vrot.slane %v4298_v26, %v407_v46  ;;  %v415_v46 = vsub.s32 6, %v4292_v22 }
 0x2b7   : > { %3706 = vmatpush3.msra.mxu0 %v903_v36  ;;  %3707 = vmatprep.mubr.msk.f32.mxu0 %vm4034_vm0, %v4033_v1 }
 0x2b8   : > { %3710 = vmatprep.subr.mxu0 %v4033_v1  ;;  %3721 = vmatprep.mubr.msk.f32.mxu1 %vm4034_vm0, %v4033_v1 }
 0x2b9   : > { %3731 = vmatprep.subr.mxu1 %v4033_v1 }
 0x35b   : > { %v4473_v63 = vpop.f32.mrf.mxu1 }
 0x35d   : > { %v3667_v15 = vpop.f32.mrf.mxu1 }
 0x363   : > { %v4475_v0 = vpop.f32.mrf.mxu1 }
 0x365   : > { %v3674_v21 = vpop.f32.mrf.mxu1 }
 0x366   : > { %v984_v21 = vadd.f32 %v4386_v3, %v408_v31  ;;  %v972_v3 = vadd.f32 %v4364_v48, %v4376_v58  ;;  %v996_v48 = vadd.f32 %v4409_v20, %v4376_v58 }
 0x36b   : > { %v1631_v25 = vpop.f32.mrf.mxu1 }
 0x36c   : > { %3911 = vtanh.f32 %v1631_v25  ;;  %v4477_v38 = vpop.f32.mrf.mxu0 }
 0x36d   : > { %v3688_v40 = vpop.f32.mrf.mxu1 }
 0x36e   : > { %v3681_v42 = vpop.f32.mrf.mxu0  ;;  %v974_v40 = vadd.f32 %v4366_v51, %v408_v31  ;;  %v976_v51 = vadd.f32 %v4369_v54, %v4376_v58  ;;  %v992_v54 = vadd.f32 %v4400_v13, %v4376_v58 }
 0x373   : > { %v1771_v41 = vpop.f32.mrf.mxu1 }
 0x374   : > { %v1701_v43 = vpop.f32.mrf.mxu0  ;;  %3913 = vtanh.f32 %v1771_v41 }
 0x375   : > { %3915 = vtanh.f32 %v1701_v43  ;;  %v3702_v44 = vpop.f32.mrf.mxu1 }
 0x376   : > { %v3695_v47 = vpop.f32.mrf.mxu0 }
 0x379   : > { %v3912_v50 = vpop.eup %3911 }
 0x37a   : > { %v1778_v52 = vmul.f32 1.442695, %v3912_v50 }
 0x37c   : > { %3917 = vpow2.f32 %v1778_v52 }
 0x381   : > { %v3914_v53 = vpop.eup %3913 }
 0x382   : > { %v3916_v60 = vpop.eup %3915  ;;  %v1782_v2 = vmul.f32 1.442695, %v3914_v53 }
 0x383   : > { %v1780_v5 = vmul.f32 1.442695, %v3916_v60 }
 0x384   : > { %3919 = vpow2.f32 %v1782_v2 }
 0x385   : > { %3921 = vpow2.f32 %v1780_v5 }
 0x389   : > { %v3918_v10 = vpop.eup %3917 }
 0x38a   : > { %v1784_v19 = vsel %vm1329_vm1, %v3918_v10, 0.0 }
 0x38b   : > { %1785 = vadd.xlane.f32.xlu1 %v1784_v19 }
 0x391   : > { %v3920_v27 = vpop.eup %3919 }
 0x392   : > { %v3922_v29 = vpop.eup %3921  ;;  %v1790_v57 = vsel %vm1329_vm1, %v3920_v27, 0.0 }
 0x393   : > { %1791 = vadd.xlane.f32.xlu1 %v1790_v57  ;;  %v1787_v33 = vsel %vm1329_vm1, %v3922_v29, 0.0 }
 0x394   : > { %1788 = vadd.xlane.f32.xlu0 %v1787_v33 }
 0x414   : > { %v1786_v49 = vpop.xlane.xlu1 %1785 }
 0x415   : > { %3923 = vrcp.f32 %v1786_v49 }
 0x41c   : > { %v1792_v37 = vpop.xlane.xlu1 %1791 }
 0x41d   : > { %3925 = vrcp.f32 %v1792_v37  ;;  %v1789_v39 = vpop.xlane.xlu0 %1788 }
 0x41e   : > { %3927 = vrcp.f32 %v1789_v39 }
 0x422   : > { %v3924_v17 = vpop.eup %3923 }
 0x423   : > { %v1796_v11 = vmul.f32 %v3924_v17, %v3918_v10 }
 0x425   : > { %3708 = vmatmul.mubr.msk.f32.vlgmr.msra.gmra.mxu0 %vm1345_vm2, %v1796_v11 }
 0x426   : > { %3711 = vmatpush3.msra.mxu0 %v4352_v35  ;;  %3714 = vmatprep.mubr.msk.f32.mxu0 %vm4034_vm0, %v4033_v1  ;;  %v970_v35 = vadd.f32 %v4362_v45, %v408_v31  ;;  %v990_v45 = vadd.f32 %v4398_v9, %v408_v31 }
 0x427   : > { %3712 = vmatprep.subr.mxu0 %v4033_v1 }
 0x428   : > { %3713 = vmatpush3.msra.mxu0 %v4346_v30  ;;  %v980_v30 = vadd.f32 %v4373_v56, %v408_v31  ;;  %v994_v56 = vadd.f32 %v4407_v18, %v408_v31 }
 0x429   : > { %3724 = vmatprep.subr.mxu0 %v4033_v1 }
 0x42a   : > { %v3926_v24 = vpop.eup %3925 }
 0x42b   : > { %v3928_v36 = vpop.eup %3927  ;;  %v1798_v15 = vmul.f32 %v3926_v24, %v3920_v27 }
 0x42c   : > { %v1797_v25 = vmul.f32 %v3928_v36, %v3922_v29 }
 0x42d   : > { %3722 = vmatmul.mubr.msk.f32.vlgmr.msra.gmra.mxu1 %vm1345_vm2, %v1798_v15  ;;  %v416_v15 = vrot.slane %v4298_v26, %v415_v46 }
 0x42e   : > { %3715 = vmatmul.mubr.msk.f32.vlgmr.msra.gmra.mxu0 %vm1345_vm2, %v1797_v25  ;;  %3732 = vmatpush3.xpose.msra.mxu1 %v984_v21 }
 0x42f   : > { %3725 = vmatpush3.xpose.msra.mxu0 %v974_v40  ;;  %3733 = vmatprep.subr.mxu1 %v4033_v1  ;;  %v1049_v25 = vadd.f32 %v4383_v62, %v416_v15  ;;  %v1059_v40 = vadd.f32 %v4405_v16, %v416_v15  ;;  %v1069_v62 = vadd.f32 %v4418_v32, %v416_v15 }
 0x430   : > { %3726 = vmatprep.subr.mxu0 %v4033_v1  ;;  %3728 = vmatprep.mubr.msk.f32.mxu0 %vm4034_vm0, %v4033_v1  ;;  %v1065_v16 = vadd.f32 %v4414_v23, %v416_v15  ;;  %v1071_v32 = vadd.f32 %v4420_v34, %v4396_v8 }
 0x431   : > { %3735 = vmatprep.mubr.msk.f32.mxu1 %vm4034_vm0, %v4033_v1 }
 0x432   : > { %3734 = vmatpush3.xpose.msra.mxu1 %v980_v30 }
 0x433   : > { %3727 = vmatpush3.xpose.msra.mxu0 %v970_v35  ;;  %3745 = vmatprep.subr.mxu1 %v4033_v1 }
 0x434   : > { %3738 = vmatprep.subr.mxu0 %v4033_v1 }
 0x435   : > { %3736 = vmatmul.mubr.f32.vlgmr.msra.gmra.mxu1 %v4475_v0 }
 0x436   : > { %3729 = vmatmul.mubr.f32.vlgmr.msra.gmra.mxu0 %v4473_v63  ;;  %3746 = vmatpush3.msra.mxu1 %v976_v51 }
 0x437   : > { %3739 = vmatpush3.xpose.msra.mxu0 %v994_v56  ;;  %3747 = vmatprep.subr.mxu1 %v4033_v1 }
 0x438   : > { %3748 = vmatpush3.msra.mxu1 %v972_v3  ;;  %3740 = vmatprep.subr.mxu0 %v4033_v1 }
 0x439   : > { %3742 = vmatprep.mubr.msk.f32.mxu0 %vm4034_vm0, %v4033_v1  ;;  %3749 = vmatprep.mubr.msk.f32.mxu1 %vm4034_vm0, %v4033_v1 }
 0x43a   : > { %3752 = vmatprep.subr.mxu1 %v4033_v1 }
 0x43b   : > { %3741 = vmatpush3.xpose.msra.mxu0 %v990_v45 }
 0x43c   : > { %3759 = vmatprep.subr.mxu0 %v4033_v1 }
 0x43e   : > { %3743 = vmatmul.mubr.f32.vlgmr.msra.gmra.mxu0 %v4477_v38 }
 0x43f   : > { %3760 = vmatpush3.msra.mxu0 %v996_v48  ;;  %3763 = vmatprep.mubr.msk.f32.mxu0 %vm4034_vm0, %v4033_v1 }
 0x440   : > { %3761 = vmatprep.subr.mxu0 %v4033_v1 }
 0x441   : > { %3762 = vmatpush3.msra.mxu0 %v992_v54 }
 0x442   : > { %3773 = vmatprep.subr.mxu0 %v4033_v1 }
 0x4e5   : > { %v4530_v9 = vpop.f32.mrf.mxu0 }
 0x4e7   : > { %v3709_v18 = vpop.f32.mrf.mxu0 }
 0x4ed   : > { %v4532_v42 = vpop.f32.mrf.mxu1 }
 0x4ee   : > { %v4534_v20 = vpop.f32.mrf.mxu0 }
 0x4ef   : > { %v3723_v41 = vpop.f32.mrf.mxu1 }
 0x4f0   : > { %v3716_v43 = vpop.f32.mrf.mxu0 }
 0x4f5   : > { %v2154_v44 = vpop.f32.mrf.mxu1 }
 0x4f6   : > { %v2084_v58 = vpop.f32.mrf.mxu0  ;;  %3929 = vtanh.f32 %v2154_v44 }
 0x4f7   : > { %3931 = vtanh.f32 %v2084_v58  ;;  %v3737_v13 = vpop.f32.mrf.mxu1 }
 0x4f8   : > { %v3730_v47 = vpop.f32.mrf.mxu0 }
 0x4fe   : > { %v2224_v50 = vpop.f32.mrf.mxu0 }
 0x4ff   : > { %3933 = vtanh.f32 %v2224_v50 }
 0x500   : > { %v3744_v52 = vpop.f32.mrf.mxu0 }
 0x503   : > { %v3930_v53 = vpop.eup %3929 }
 0x504   : > { %v3932_v60 = vpop.eup %3931  ;;  %v2233_v2 = vmul.f32 1.442695, %v3930_v53 }
 0x505   : > { %v2231_v5 = vmul.f32 1.442695, %v3932_v60 }
 0x506   : > { %3935 = vpow2.f32 %v2233_v2 }
 0x507   : > { %3937 = vpow2.f32 %v2231_v5 }
 0x50c   : > { %v3934_v10 = vpop.eup %3933 }
 0x50d   : > { %v2235_v19 = vmul.f32 1.442695, %v3934_v10 }
 0x50f   : > { %3939 = vpow2.f32 %v2235_v19 }
 0x513   : > { %v3936_v27 = vpop.eup %3935 }
 0x514   : > { %v3938_v29 = vpop.eup %3937  ;;  %v2240_v57 = vsel %vm1329_vm1, %v3936_v27, 0.0 }
 0x515   : > { %2241 = vadd.xlane.f32.xlu1 %v2240_v57  ;;  %v2237_v33 = vsel %vm1329_vm1, %v3938_v29, 0.0 }
 0x516   : > { %2238 = vadd.xlane.f32.xlu0 %v2237_v33 }
 0x51c   : > { %v3940_v49 = vpop.eup %3939 }
 0x51d   : > { %v2243_v37 = vsel %vm1329_vm1, %v3940_v49, 0.0 }
 0x51e   : > { %2244 = vadd.xlane.f32.xlu0 %v2243_v37  ;;  %v2930_v37 = vsel %vm2924_vm3, %v4530_v9, 0.0 }
 0x59e   : > { %v2242_v39 = vpop.xlane.xlu1 %2241 }
 0x59f   : > { %v2239_v17 = vpop.xlane.xlu0 %2238 }
 0x5a0   : > { %3941 = vrcp.f32 %v2239_v17 }
 0x5a1   : > { %3943 = vrcp.f32 %v2242_v39 }
 0x5a7   : > { %v2245_v11 = vpop.xlane.xlu0 %2244 }
 0x5a8   : > { %3945 = vrcp.f32 %v2245_v11  ;;  %v2933_v11 = vsel %vm2924_vm3, %v4532_v42, 0.0 }
 0x5ad   : > { %v3942_v31 = vpop.eup %3941 }
 0x5ae   : > { %v2249_v24 = vmul.f32 %v3942_v31, %v3938_v29  ;;  %v3944_v36 = vpop.eup %3943  ;;  %v3874_v29 = vld [vmem:[%s4194_s16 + $0xf8] sm:$0xff]  }
 0x5af   : > { %v2250_v21 = vmul.f32 %v3944_v36, %v3936_v27 }
 0x5b0   : > { %3750 = vmatmul.mubr.msk.f32.vlgmr.msra.gmra.mxu1 %vm1345_vm2, %v2249_v24 }
 0x5b1   : > { %3753 = vmatpush3.msra.mxu1 %v4391_v6  ;;  %3756 = vmatprep.mubr.msk.f32.mxu1 %vm4034_vm0, %v4033_v1  ;;  %v1045_v6 = vadd.f32 %v4371_v55, %v416_v15  ;;  %v1051_v55 = vadd.f32 %v4388_v4, %v4396_v8 }
 0x5b2   : > { %3754 = vmatprep.subr.mxu1 %v4033_v1 }
 0x5b3   : > { %3755 = vmatpush3.msra.mxu1 %v4381_v61  ;;  %v1055_v61 = vadd.f32 %v4393_v7, %v416_v15  ;;  %v1047_v7 = vadd.f32 %v4378_v59, %v4396_v8  ;;  %v1067_v59 = vadd.f32 %v4416_v28, %v4396_v8 }
 0x5b4   : > { %3766 = vmatprep.subr.mxu1 %v4033_v1  ;;  %3757 = vmatmul.mubr.msk.f32.vlgmr.msra.gmra.mxu1 %vm1345_vm2, %v2250_v21  ;;  %v3860_v21 = vld [vmem:[%s4194_s16 + $0x70] sm:$0xff]  }
 0x5b5   : > { %v3946_v22 = vpop.eup %3945  ;;  %3767 = vmatpush3.xpose.msra.mxu1 %v1049_v25  ;;  %3770 = vmatprep.mubr.msk.f32.mxu1 %vm4034_vm0, %v4033_v1 }
 0x5b6   : > { %3768 = vmatprep.subr.mxu1 %v4033_v1  ;;  %v2251_v26 = vmul.f32 %v3946_v22, %v3940_v49  ;;  %v2931_v49 = vsel %vm2924_vm3, %v4534_v20, 0.0  ;;  %v3861_v22 = vld [vmem:[%s4194_s16 + $0x30] sm:$0xff]  }
 0x5b7   : > { %v2932_v39 = vadd.f32 %v2931_v49, %v2930_v37 }
 0x5b8   : > { %3764 = vmatmul.mubr.msk.f32.vlgmr.msra.gmra.mxu0 %vm1345_vm2, %v2251_v26  ;;  %v3875_v26 = vld [vmem:[%s4194_s16 + $0xb8] sm:$0xff]  }
 0x5b9   : > { %3769 = vmatpush3.xpose.msra.mxu1 %v1045_v6  ;;  %3774 = vmatpush3.xpose.msra.mxu0 %v1059_v40  ;;  %v2934_v46 = vadd.f32 %v2933_v11, %v2932_v39  ;;  %v3862_v6 = vld [vmem:[%s4194_s16 + $0x68] sm:$0xff]   ;;  %v3876_v40 = vld [vmem:[%s4194_s16 + $0xf0] sm:$0xff]  }
 0x5ba   : > { %3775 = vmatprep.subr.mxu0 %v4033_v1  ;;  %3780 = vmatprep.subr.mxu1 %v4033_v1 }
 0x5bb   : > { %3777 = vmatprep.mubr.msk.f32.mxu0 %vm4034_vm0, %v4033_v1  ;;  %v2946_v36 = vmul.f32 0.33333334, %v2934_v46 }
 0x5bc   : > { %3771 = vmatmul.mubr.f32.vlgmr.msra.gmra.mxu1 %v4530_v9  ;;  %v3859_v9 = vld [vmem:[%s4194_s16 + $0x38] sm:$0xff]  }
 0x5bd   : > { %3776 = vmatpush3.xpose.msra.mxu0 %v1055_v61  ;;  %3781 = vmatpush3.xpose.msra.mxu1 %v1069_v62  ;;  %v2950_v25 = vpack.c.bf16 %v2946_v36, %v2946_v36  ;;  %v3877_v61 = vld [vmem:[%s4194_s16 + $0xb0] sm:$0xff]   ;;  %v3864_v62 = vld [vmem:[%s4194_s16 + $0x60] sm:$0xff]  }
 0x5be   : > { %3782 = vmatprep.subr.mxu1 %v4033_v1  ;;  %3787 = vmatprep.subr.mxu0 %v4033_v1 }
 0x5bf   : > { %3784 = vmatprep.mubr.msk.f32.mxu1 %vm4034_vm0, %v4033_v1 }
 0x5c0   : > { %3778 = vmatmul.mubr.f32.vlgmr.msra.gmra.mxu0 %v4534_v20  ;;  %v3858_v20 = vld [vmem:[%s4194_s16 + $0x78] sm:$0xff]  }
 0x5c1   : > { %3783 = vmatpush3.xpose.msra.mxu1 %v1065_v16  ;;  %3788 = vmatpush3.msra.mxu0 %v1051_v55  ;;  %v3878_v55 = vld [vmem:[%s4194_s16 + $0xe8] sm:$0xff]   ;;  %v3865_v16 = vld [vmem:[%s4194_s16 + $0x20] sm:$0xff]  }
 0x5c2   : > { %3789 = vmatprep.subr.mxu0 %v4033_v1  ;;  %3801 = vmatprep.subr.mxu1 %v4033_v1 }
 0x5c3   : > { %3790 = vmatpush3.msra.mxu0 %v1047_v7  ;;  %3791 = vmatprep.mubr.msk.f32.mxu0 %vm4034_vm0, %v4033_v1  ;;  %v3879_v7 = vld [vmem:[%s4194_s16 + $0xa8] sm:$0xff]  }
 0x5c4   : > { %3785 = vmatmul.mubr.f32.vlgmr.msra.gmra.mxu1 %v4532_v42  ;;  %3794 = vmatprep.subr.mxu0 %v4033_v1 }
 0x5c5   : > { %3802 = vmatpush3.msra.mxu1 %v1071_v32  ;;  %3805 = vmatprep.mubr.msk.f32.mxu1 %vm4034_vm0, %v4033_v1  ;;  %v3866_v32 = vld [vmem:[%s4194_s16 + $0x58] sm:$0xff]  }
 0x5c6   : > { %3803 = vmatprep.subr.mxu1 %v4033_v1 }
 0x5c7   : > { %3804 = vmatpush3.msra.mxu1 %v1067_v59  ;;  %v3880_v59 = vld [vmem:[%s4194_s16 + $0xe0] sm:$0xff]  }
 0x5c8   : > { %3618 = vmatprep.subr.bf16.mxu1 %v3874_v29 }
 0x670   : > { %v2321_v4 = vpop.f32.mrf.mxu1 }
 0x671   : > { %v2935_v30 = vsel %vm2924_vm3, %v2321_v4, 0.0  ;;  %v3867_v4 = vld [vmem:[%s4194_s16 + $0x18] sm:$0xff]  }
 0x672   : > { %v3751_v23 = vpop.f32.mrf.mxu1 }
 0x673   : > { %v3881_v23 = vld [vmem:[%s4194_s16 + $0xa0] sm:$0xff]  }
 0x674   : > { %v2394_v34 = vpop.f32.mrf.mxu1 }
 0x675   : > { %v2936_v35 = vsel %vm2924_vm3, %v2394_v34, 0.0  ;;  %v3868_v34 = vld [vmem:[%s4194_s16 + $0x50] sm:$0xff]  }
 0x676   : > { %v2937_v51 = vadd.f32 %v2936_v35, %v2935_v30  ;;  %v3758_v56 = vpop.f32.mrf.mxu1  ;;  %v2926_v30 = vsel %vm2924_vm3, %v4475_v0, 0.0  ;;  %v3869_v35 = vld [vmem:[%s4194_s16 + $0x10] sm:$0xff]   ;;  %v3872_v0 = vld [vmem:[%s4194_s16 + $0x40] sm:$0xff]  }
 0x677   : > { %v2925_v56 = vsel %vm2924_vm3, %v4473_v63, 0.0 }
 0x678   : > { %v2467_v3 = vpop.f32.mrf.mxu0 }
 0x679   : > { %v2938_v8 = vsel %vm2924_vm3, %v2467_v3, 0.0  ;;  %v2928_v3 = vsel %vm2924_vm3, %v4477_v38, 0.0  ;;  %v3882_v38 = vld [vmem:[%s4194_s16 + $0xd8] sm:$0xff]  }
 0x67a   : > { %v4589_v28 = vadd.f32 %v2938_v8, %v2937_v51  ;;  %v3765_v45 = vpop.f32.mrf.mxu0  ;;  %v3870_v51 = vld [vmem:[%s4194_s16 + $0x48] sm:$0xff]   ;;  %v2927_v8 = vadd.f32 %v2926_v30, %v2925_v56 }
 0x67b   : > { %v3871_v45 = vld [vmem:[%s4194_s16 + $0x8] sm:$0xff]  }
 0x67c   : > { %v2537_v48 = vpop.f32.mrf.mxu1  ;;  %v2947_v49 = vmul.f32 0.33333334, %v4589_v28 }
 0x67d   : > { %3947 = vtanh.f32 %v2537_v48  ;;  %v2929_v48 = vadd.f32 %v2928_v3, %v2927_v8 }
 0x67e   : > { %v3772_v54 = vpop.f32.mrf.mxu1 }
 0x67f   : > { %v3873_v54 = vld [vmem:[%s4194_s16] sm:$0xff]  }
 0x680   : > { %v2607_v18 = vpop.f32.mrf.mxu0 }
 0x681   : > { %3949 = vtanh.f32 %v2607_v18  ;;  %v2945_v18 = vmul.f32 0.33333334, %v2929_v48 }
 0x682   : > { %v3779_v41 = vpop.f32.mrf.mxu0 }
 0x683   : > { %v2949_v63 = vpack.c.bf16 %v2945_v18, %v2945_v18  ;;  %v3883_v41 = vld [vmem:[%s4194_s16 + $0x98] sm:$0xff]  }
 0x684   : > { %v2677_v43 = vpop.f32.mrf.mxu1 }
 0x685   : > { %3951 = vtanh.f32 %v2677_v43  ;;  %v3884_v43 = vld [vmem:[%s4194_s16 + $0xd0] sm:$0xff]  }
 0x686   : > { %v3786_v44 = vpop.f32.mrf.mxu1 }
 0x687   : > { %v3885_v44 = vld [vmem:[%s4194_s16 + $0x90] sm:$0xff]  }
 0x68a   : > { %v3948_v58 = vpop.eup %3947 }
 0x68b   : > { %v2684_v13 = vmul.f32 1.442695, %v3948_v58  ;;  %v3886_v58 = vld [vmem:[%s4194_s16 + $0xc8] sm:$0xff]  }
 0x68d   : > { %3953 = vpow2.f32 %v2684_v13  ;;  %v3887_v13 = vld [vmem:[%s4194_s16 + $0x88] sm:$0xff]  }
 0x68e   : > { %v3950_v47 = vpop.eup %3949 }
 0x68f   : > { %v2686_v50 = vmul.f32 1.442695, %v3950_v47  ;;  %v3888_v47 = vld [vmem:[%s4194_s16 + $0xc0] sm:$0xff]  }
 0x691   : > { %3955 = vpow2.f32 %v2686_v50  ;;  %v3889_v50 = vld [vmem:[%s4194_s16 + $0x80] sm:$0xff]  }
 0x692   : > { %v3952_v52 = vpop.eup %3951 }
 0x693   : > { %v2688_v53 = vmul.f32 1.442695, %v3952_v52 }
 0x695   : > { %3957 = vpow2.f32 %v2688_v53 }
 0x69a   : > { %v3954_v60 = vpop.eup %3953 }
 0x69b   : > { %v2690_v2 = vsel %vm1329_vm1, %v3954_v60, 0.0 }
 0x69c   : > { %2691 = vadd.xlane.f32.xlu1 %v2690_v2 }
 0x69e   : > { %v3956_v5 = vpop.eup %3955 }
 0x69f   : > { %v2693_v10 = vsel %vm1329_vm1, %v3956_v5, 0.0 }
 0x6a0   : > { %2694 = vadd.xlane.f32.xlu0 %v2693_v10 }
 0x6a2   : > { %v3958_v19 = vpop.eup %3957 }
 0x6a3   : > { %v2696_v27 = vsel %vm1329_vm1, %v3958_v19, 0.0 }
 0x6a4   : > { %2697 = vadd.xlane.f32.xlu1 %v2696_v27 }
 0x725   : > { %v2692_v57 = vpop.xlane.xlu1 %2691 }
 0x726   : > { %3959 = vrcp.f32 %v2692_v57 }
 0x729   : > { %v2695_v33 = vpop.xlane.xlu0 %2694 }
 0x72a   : > { %3961 = vrcp.f32 %v2695_v33 }
 0x72d   : > { %v2698_v17 = vpop.xlane.xlu1 %2697 }
 0x72e   : > { %3963 = vrcp.f32 %v2698_v17  ;;  %v2951_v17 = vpack.c.bf16 %v2947_v49, %v2947_v49 }
 0x733   : > { %v3960_v31 = vpop.eup %3959 }
 0x734   : > { %v2702_v24 = vmul.f32 %v3960_v31, %v3954_v60 }
 0x736   : > { %3792 = vmatmul.mubr.msk.f32.vlgmr.msra.gmra.mxu0 %vm1345_vm2, %v2702_v24 }
 0x737   : > { %v3962_v15 = vpop.eup %3961  ;;  %3795 = vmatpush3.msra.mxu0 %v4412_v12  ;;  %3798 = vmatprep.mubr.msk.f32.mxu0 %vm4034_vm0, %v4033_v1 }
 0x738   : > { %3796 = vmatprep.subr.mxu0 %v4033_v1  ;;  %v2703_v42 = vmul.f32 %v3962_v15, %v3956_v5 }
 0x739   : > { %3797 = vmatpush3.msra.mxu0 %v4403_v14  ;;  %v3863_v14 = vld [vmem:[%s4194_s16 + $0x28] sm:$0xff]  }
 0x73a   : > { %3596 = vmatprep.subr.bf16.mxu0 %v3858_v20  ;;  %3799 = vmatmul.mubr.msk.f32.vlgmr.msra.gmra.mxu0 %vm1345_vm2, %v2703_v42  ;;  %v3017_v20 = vld [vmem:[%s308_s30] sm:$0x1] }
 0x73b   : > { %v3964_v12 = vpop.eup %3963  ;;  %3597 = vmatpush3.bf16.msra.mxu0 %v3859_v9  ;;  %3242 = vmatprep.mubr.bf16.mxu0 %v2950_v25 }
 0x73c   : > { %3598 = vmatprep.subr.bf16.mxu0 %v3860_v21  ;;  %v2704_v1 = vmul.f32 %v3964_v12, %v3958_v19 }
 0x73e   : > { %3806 = vmatmul.mubr.msk.f32.vlgmr.msra.gmra.mxu1 %vm1345_vm2, %v2704_v1 }
 0x73f   : > { %3599 = vmatpush3.bf16.msra.mxu0 %v3861_v22  ;;  %3619 = vmatpush3.bf16.msra.mxu1 %v3875_v26 }
 0x740   : > { %3600 = vmatprep.subr.bf16.mxu0 %v3862_v6  ;;  %3620 = vmatprep.subr.bf16.mxu1 %v3876_v40 }
 0x743   : > { %3601 = vmatpush3.bf16.msra.mxu0 %v3863_v14  ;;  %3621 = vmatpush3.bf16.msra.mxu1 %v3877_v61 }
 0x744   : > { %3602 = vmatprep.subr.bf16.mxu0 %v3864_v62  ;;  %3622 = vmatprep.subr.bf16.mxu1 %v3878_v55 }
 0x747   : > { %3603 = vmatpush3.bf16.msra.mxu0 %v3865_v16  ;;  %3623 = vmatpush3.bf16.msra.mxu1 %v3879_v7 }
 0x748   : > { %3604 = vmatprep.subr.bf16.mxu0 %v3866_v32  ;;  %3624 = vmatprep.subr.bf16.mxu1 %v3880_v59 }
 0x74b   : > { %3605 = vmatpush3.bf16.msra.mxu0 %v3867_v4  ;;  %3625 = vmatpush3.bf16.msra.mxu1 %v3881_v23 }
 0x74c   : > { %3606 = vmatprep.subr.bf16.mxu0 %v3868_v34  ;;  %3626 = vmatprep.subr.bf16.mxu1 %v3882_v38 }
 0x74f   : > { %3607 = vmatpush3.bf16.msra.mxu0 %v3869_v35  ;;  %3627 = vmatpush3.bf16.msra.mxu1 %v3883_v41 }
 0x750   : > { %3608 = vmatprep.subr.bf16.mxu0 %v3870_v51  ;;  %3628 = vmatprep.subr.bf16.mxu1 %v3884_v43 }
 0x753   : > { %3609 = vmatpush3.bf16.msra.mxu0 %v3871_v45  ;;  %3629 = vmatpush3.bf16.msra.mxu1 %v3885_v44 }
 0x754   : > { %3610 = vmatprep.subr.bf16.mxu0 %v3872_v0  ;;  %3630 = vmatprep.subr.bf16.mxu1 %v3886_v58 }
 0x757   : > { %3611 = vmatpush3.bf16.msra.mxu0 %v3873_v54  ;;  %3631 = vmatpush3.bf16.msra.mxu1 %v3887_v13 }
 0x758   : > { %3632 = vmatprep.subr.bf16.mxu1 %v3888_v47 }
 0x75a   : > { %3243 = vmatmul.mubr.bf16.vlgmr.msra.gmra.mxu0 %v2949_v63 }
 0x75b   : > { %3633 = vmatpush3.bf16.msra.mxu1 %v3889_v50 }
 0x7f6   : > { %v2774_v52 = vpop.f32.mrf.mxu0 }
 0x7f7   : > { %v2940_v10 = vsel %vm2924_vm3, %v2774_v52, 0.0 }
 0x7f8   : > { %v3793_v53 = vpop.f32.mrf.mxu0 }
 0x7fa   : > { %v2847_v60 = vpop.f32.mrf.mxu0 }
 0x7fb   : > { %v2941_v2 = vsel %vm2924_vm3, %v2847_v60, 0.0 }
 0x7fc   : > { %v3800_v5 = vpop.f32.mrf.mxu0  ;;  %v2942_v19 = vadd.f32 %v2941_v2, %v2940_v10 }
 0x7fe   : > { %v2920_v27 = vpop.f32.mrf.mxu1 }
 0x7ff   : > { %v2943_v29 = vsel %vm2924_vm3, %v2920_v27, 0.0 }
 0x800   : > { %v2944_v57 = vadd.f32 %v2943_v29, %v2942_v19  ;;  %v3807_v33 = vpop.f32.mrf.mxu1 }
 0x802   : > { %v2948_v37 = vmul.f32 0.33333334, %v2944_v57 }
 0x804   : > { %v2952_v39 = vpack.c.bf16 %v2948_v37, %v2948_v37 }
 0x806   : > { %3282 = vmatprep.mubr.bf16.mxu1 %v2952_v39 }
 0x807   : > { %3283 = vmatmul.mubr.bf16.vlgmr.msra.gmra.mxu1 %v2951_v17 }
 0x81a   : > { %v3612_v11 = vpop.f32.mrf.mxu0 }
 0x81c   : > { %v3613_v46 = vpop.f32.mrf.mxu0 }
 0x81d   : > { %v3614_v31 = vadd.f32 %v3613_v46, %v3612_v11 }
 0x81e   : > { %v3615_v24 = vpop.f32.mrf.mxu0 }
 0x81f   : > { %v3245_v42 = vadd.f32 %v3614_v31, %v3017_v20 }
 0x820   : > { %v3616_v36 = vpop.f32.mrf.mxu0 }
 0x8c7   : > { %v3634_v15 = vpop.f32.mrf.mxu1 }
 0x8c9   : > { %v3635_v9 = vpop.f32.mrf.mxu1 }
 0x8ca   : > { %v3636_v28 = vadd.f32 %v3635_v9, %v3634_v15 }
 0x8cb   : > { %v3637_v21 = vpop.f32.mrf.mxu1 }
 0x8cc   : > { %v3285_v25 = vadd.f32 %v3636_v28, %v3245_v42 }
 0x8cd   : > { %v3638_v12 = vpop.f32.mrf.mxu1 }
 0x8ce   : > { %3290 = vst [vmem:[%s311_s9] sm:$0x1] %v3285_v25 }
 0x8cf PF: > { %p15_p9 = scmp.ge.s32.totalorder %s4087_s23, 5   ;;  %s4682_s18 = smov %s4019_s19 }
 0x8d0   : > { %s4683_s19 = smov %s4023_s20  ;;  %s4684_s20 = smov %s4097_s26 }
 0x8d1   : > { %s4685_s21 = smov %s4087_s23  ;;  %17 = sbr.rel (!%p15_p9) target bundleno = 3 (0x3), region = 92 }
 0x8d6   :  { %3308 = vsyncpa [#allocation3], 1 }
 0x8d7   :  { %3310 = vsyncpa [#allocation3 + $0x1], 1 }

</bundles_post_ra>
